<compile_context>
chip_gen: v7x
topology: tpu7x:2x2x1
jax: 0.10.0
libtpu: 0.0.40
codegen_flags: <defaults>
</compile_context>

<pallas_src>
import functools

import jax
import jax.numpy as jnp
from jax.experimental import pallas as pl
from jax.experimental.pallas import tpu as pltpu


# ----------------------------- layout constants -----------------------------
_CIN, _C1, _C2 = 3, 6, 16       # real channel counts (input, conv1, conv2)
_CINP, _C1P = 4, 8              # padded channel sub-blocks inside a lane group
_K = 5                          # conv kernel size
_H = 32                         # input spatial size
_PW1 = 16                       # padded pooled-width slots after conv1 (14 used)
_PW2 = 8                        # padded pooled-width slots after conv2 (5 used)
_LANE = 128


# ------------------------------- fused kernel -------------------------------
def _lenet32_fused_kernel(x_ref, w1_ref, b1_ref, w2_ref, b2_ref,
                          fw1_ref, fb1_ref, fw2_ref, fb2_ref, fw3_ref, fb3_ref,
                          out_ref, *, bn):
    # Row convention everywhere: row = spatial_index * bn + sample (batch minor).
    # bn % 8 == 0 => every banded slice below starts on a sublane-tile boundary.
    m1 = 14 * bn                # conv1/pool1 rows: (oh//2, sample), oh//2 in [0,14)
    m2 = 10 * bn                # conv2 rows:       (oh2,   sample), oh2   in [0,10)

    # ---- conv1 + bias + ReLU: 3 banded shift-matmuls, K=256, 512 output lanes.
    # Bias is folded into the accumulator init; LHS cast to bf16, accum in f32.
    acc1 = jnp.broadcast_to(b1_ref[...], (m1, 2 * 2 * _PW1 * _C1P))
    for s in range(3):
        lhs = x_ref[s * bn: s * bn + m1, :].astype(jnp.bfloat16)
        acc1 = acc1 + jnp.dot(lhs, w1_ref[s],
                              preferred_element_type=jnp.float32)
    y1 = jnp.maximum(acc1, 0.0)                                      # (14bn, 512) f32

    # ---- 2x2 max-pool #1: the pooling parities are the four lane quarters ----
    p1 = jnp.maximum(jnp.maximum(y1[:, 0:128], y1[:, 128:256]),
                     jnp.maximum(y1[:, 256:384], y1[:, 384:512]))    # (14bn, 128) f32

    # ---- conv2 + bias + ReLU: one K=640 matmul (5 banded views, lane-concat) ----
    lhs2 = jnp.concatenate([p1[k * bn: k * bn + m2, :] for k in range(_K)],
                           axis=1).astype(jnp.bfloat16)              # (10bn, 640)
    y2 = jnp.maximum(jnp.dot(lhs2, w2_ref[...],
                             preferred_element_type=jnp.float32)
                     + b2_ref[...], 0.0)                             # (10bn, 256) f32

    # ---- 2x2 max-pool #2, horizontal half: ow2 parity is the two lane halves ----
    h2 = jnp.maximum(y2[:, 0:128], y2[:, 128:256])                   # (10bn, 128) f32

    # ---- pool #2 vertical + fc1 as ONE K=640 matmul (NCHW flatten in fw1) ----
    pooled = jnp.concatenate(
        [jnp.maximum(h2[(2 * h) * bn: (2 * h + 1) * bn, :],
                     h2[(2 * h + 1) * bn: (2 * h + 2) * bn, :]) for h in range(5)],
        axis=1).astype(jnp.bfloat16)                                 # (bn, 640)
    hid = jnp.maximum(jnp.dot(pooled, fw1_ref[...],
                              preferred_element_type=jnp.float32)
                      + fb1_ref[...], 0.0)                           # fc1 + ReLU
    hid = jnp.maximum(jnp.dot(hid.astype(jnp.bfloat16), fw2_ref[...],
                              preferred_element_type=jnp.float32)
                      + fb2_ref[...], 0.0)                           # fc2 + ReLU
    logits = jnp.dot(hid.astype(jnp.bfloat16), fw3_ref[...],
                     preferred_element_type=jnp.float32) + fb3_ref[...]
    out_ref[...] = logits.astype(out_ref.dtype)                      # (bn, 128)


# --------------------------- one-time weight packing --------------------------
def _pack_conv1(w, b):
    """conv1 (6,3,5,5) -> banded (3,256,512) bf16; out lanes (oh%2,ow%2,ow//2,cout)."""
    wt = jnp.transpose(w, (2, 3, 1, 0))                            # (kh,kw,cin,cout)
    wt = jnp.pad(wt, ((0, 0), (0, 0), (0, _CINP - _CIN), (0, _C1P - _C1)))
    s = jnp.arange(3)[:, None, None]
    hpar = jnp.arange(2)[None, :, None]
    ohpar = jnp.arange(2)[None, None, :]
    kh = 2 * s + hpar - ohpar                                      # (3,2,2)
    kh_ok = (kh >= 0) & (kh < _K)
    w_i = jnp.arange(_H)[:, None, None]
    owpar = jnp.arange(2)[None, :, None]
    owp = jnp.arange(_PW1)[None, None, :]
    kw = w_i - (2 * owp + owpar)                                   # (32,2,16)
    kw_ok = (kw >= 0) & (kw < _K) & (owp < 14)
    khc = jnp.clip(kh, 0, _K - 1).reshape(3, 2, 2, 1, 1, 1)
    kwc = jnp.clip(kw, 0, _K - 1).reshape(1, 1, 1, _H, 2, _PW1)
    t = wt[khc, kwc]                          # (3,2,2,32,2,16,4,8) [s,hp,ohp,w,owp,owq,cin,cout]
    mask = kh_ok.reshape(3, 2, 2, 1, 1, 1, 1, 1) & kw_ok.reshape(1, 1, 1, _H, 2, _PW1, 1, 1)
    t = t * mask.astype(t.dtype)
    # -> [s, (h%2, w, cin), (oh%2, ow%2, ow//2, cout)]
    t = jnp.transpose(t, (0, 1, 3, 6, 2, 4, 5, 7))
    wb = t.reshape(3, 2 * _H * _CINP, 2 * 2 * _PW1 * _C1P)
    bb = jnp.broadcast_to(b, (2, 2, 14, _C1))
    bb = jnp.pad(bb, ((0, 0), (0, 0), (0, _PW1 - 14), (0, _C1P - _C1)))
    return wb.astype(jnp.bfloat16), bb.reshape(1, 2 * 2 * _PW1 * _C1P).astype(jnp.float32)


def _pack_conv2(w, b):
    """conv2 (16,6,5,5) -> stacked banded (640,256) bf16; out lanes (ow2%2,ow2//2,cout)."""
    wt = jnp.transpose(w, (2, 3, 1, 0))                            # (kh,kw,cin,cout)
    wt = jnp.pad(wt, ((0, 0), (0, 0), (0, _C1P - _C1), (0, 0)))    # cin 6 -> 8
    pw = jnp.arange(_PW1)[:, None, None]
    owpar = jnp.arange(2)[None, :, None]
    owp = jnp.arange(_PW2)[None, None, :]
    kw = pw - (2 * owp + owpar)                                    # (16,2,8)
    kw_ok = (kw >= 0) & (kw < _K) & (owp < 5)
    kwc = jnp.clip(kw, 0, _K - 1)
    t = wt[jnp.arange(_K).reshape(_K, 1, 1, 1), kwc.reshape(1, _PW1, 2, _PW2)]
    t = t * kw_ok.reshape(1, _PW1, 2, _PW2, 1, 1).astype(t.dtype)  # (5,16,2,8,8,16)
    t = jnp.transpose(t, (0, 1, 4, 2, 3, 5))                       # [k,pw,cin,par,owq,cout]
    wb = t.reshape(_K * _PW1 * _C1P, 2 * _PW2 * _C2)               # (640, 256), k outer
    bb = jnp.broadcast_to(b, (2, 5, _C2))
    bb = jnp.pad(bb, ((0, 0), (0, _PW2 - 5), (0, 0)))
    return wb.astype(jnp.bfloat16), bb.reshape(1, 2 * _PW2 * _C2).astype(jnp.float32)


def _pack_fc1(w, b):
    """fc1 (400,120): NCHW flatten order folded into the rows; stacked to (640,128)."""
    t = w.reshape(_C2, 5, 5, w.shape[1])                           # [c2, h, w, out]
    t = jnp.transpose(t, (1, 2, 0, 3))                             # [h, w, c2, out]
    t = jnp.pad(t, ((0, 0), (0, _PW2 - 5), (0, 0), (0, _LANE - t.shape[-1])))
    wb = t.reshape(5 * _PW2 * _C2, _LANE)                          # (640, 128), h outer
    bb = jnp.pad(b, (0, _LANE - b.shape[0])).reshape(1, _LANE)
    return wb.astype(jnp.bfloat16), bb.astype(jnp.float32)


def _pack_fc(w, b):
    wb = jnp.pad(w, ((0, _LANE - w.shape[0]), (0, _LANE - w.shape[1])))
    bb = jnp.pad(b, (0, _LANE - b.shape[0])).reshape(1, _LANE)
    return wb.astype(jnp.bfloat16), bb.astype(jnp.float32)


def pack_params(params):
    """Run ONCE (init / checkpoint load) -- not per forward call."""
    w1, b1 = _pack_conv1(params["conv1_w"], params["conv1_b"])
    w2, b2 = _pack_conv2(params["conv2_w"], params["conv2_b"])
    fw1, fb1 = _pack_fc1(params["fc1_w"], params["fc1_b"])
    fw2, fb2 = _pack_fc(params["fc2_w"], params["fc2_b"])
    fw3, fb3 = _pack_fc(params["fc3_w"], params["fc3_b"])
    return {"w1": w1, "b1": b1, "w2": w2, "b2": b2,
            "fw1": fw1, "fb1": fb1, "fw2": fw2, "fb2": fb2,
            "fw3": fw3, "fb3": fb3}


# ------------------------------- input packing -------------------------------
def _pack_input(x_nchw, bn):
    """NCHW -> per-tile rows (h//2)*bn + sample, lanes (h%2, w, cin_pad4) = 256."""
    n = x_nchw.shape[0]
    t = -(-n // bn)
    n_pad = t * bn
    x = jnp.pad(x_nchw.astype(jnp.float32), ((0, n_pad - n), (0, 0), (0, 0), (0, 0)))
    x = jnp.transpose(x, (0, 2, 3, 1))                              # (Np,32,32,3)
    x = jnp.pad(x, ((0, 0), (0, 0), (0, 0), (0, _CINP - _CIN)))     # cin 3 -> 4
    x = x.reshape(t, bn, 16, 2, _H, _CINP)
    x = jnp.transpose(x, (0, 2, 1, 3, 4, 5))                        # (t,16,bn,2,32,4)
    return x.reshape(t * 16 * bn, 2 * _H * _CINP)                   # (t*16*bn, 256)


# ------------------------------- LeNet32 model -------------------------------
def init_params(key, n_classes):
    """Deterministic synthetic params (PyTorch-style uniform(+-1/sqrt(fan_in)))."""
    def uni(k, shape, fan_in):
        bound = 1.0 / float(fan_in) ** 0.5
        return jax.random.uniform(k, shape, jnp.float32, -bound, bound)

    ks = jax.random.split(key, 10)
    return {
        "conv1_w": uni(ks[0], (6, 3, 5, 5), 3 * 5 * 5),    # PyTorch OIHW layout
        "conv1_b": uni(ks[1], (6,), 3 * 5 * 5),
        "conv2_w": uni(ks[2], (16, 6, 5, 5), 6 * 5 * 5),
        "conv2_b": uni(ks[3], (16,), 6 * 5 * 5),
        "fc1_w": uni(ks[4], (400, 120), 400),              # stored (in, out)
        "fc1_b": uni(ks[5], (120,), 400),
        "fc2_w": uni(ks[6], (120, 84), 120),
        "fc2_b": uni(ks[7], (84,), 120),
        "fc3_w": uni(ks[8], (84, n_classes), 84),
        "fc3_b": uni(ks[9], (n_classes,), 84),
    }


def lenet32_forward(x_nchw, packed, *, n_classes, bn=8):
    """Matches LeNet32.forward: returns (logits, None).  `packed` = pack_params(...)."""
    assert bn % 8 == 0, "bn (batch tile) must be a multiple of 8 for sublane alignment"
    n = x_nchw.shape[0]
    xp = _pack_input(x_nchw, bn)                                    # (tiles*16*bn, 256) f32
    num_tiles = xp.shape[0] // (16 * bn)

    weights = (packed["w1"], packed["b1"], packed["w2"], packed["b2"],
               packed["fw1"], packed["fb1"], packed["fw2"], packed["fb2"],
               packed["fw3"], packed["fb3"])

    def resident(a):
        # Full-array block, constant index_map -> stays VMEM-resident across steps.
        zero = (0,) * a.ndim
        return pl.BlockSpec(a.shape, lambda i, _z=zero: _z)

    flops = num_tiles * 2 * (3 * (14 * bn) * 256 * 512          # conv1
                             + (10 * bn) * 640 * 256            # conv2
                             + bn * 640 * 128                   # fc1
                             + 2 * bn * 128 * 128)              # fc2 + fc3
    bytes_accessed = (xp.size * xp.dtype.itemsize
                      + sum(w.size * w.dtype.itemsize for w in weights)
                      + num_tiles * bn * _LANE * 4)

    out = pl.pallas_call(
        functools.partial(_lenet32_fused_kernel, bn=bn),
        out_shape=jax.ShapeDtypeStruct((num_tiles * bn, _LANE), jnp.float32),
        grid=(num_tiles,),
        in_specs=[pl.BlockSpec((16 * bn, 2 * _H * _CINP), lambda i: (i, 0))]
                 + [resident(w) for w in weights],
        out_specs=pl.BlockSpec((bn, _LANE), lambda i: (i, 0)),
        compiler_params=pltpu.CompilerParams(
            dimension_semantics=("parallel",),          # v7x: use both TensorCores
            vmem_limit_bytes=48 * 1024 * 1024),         # explicit, fits v5e/v6e/v7x
        cost_estimate=pl.CostEstimate(flops=flops, transcendentals=0,
                                      bytes_accessed=bytes_accessed),
    )(xp, *weights)

    # Lane-dense kernel output; drop batch padding and keep only the real classes.
    return out[:n, :n_classes], None  # activations is always None in the module


# ------------------------- pure-JAX reference (check) -------------------------
def lenet32_reference(x, params):
    dn = ("NCHW", "OIHW", "NCHW")
    y = jax.lax.conv_general_dilated(x, params["conv1_w"], (1, 1), "VALID",
                                     dimension_numbers=dn)
    y = jnp.maximum(y + params["conv1_b"][None, :, None, None], 0.0)
    y = jax.lax.reduce_window(y, -jnp.inf, jax.lax.max,
                              (1, 1, 2, 2), (1, 1, 2, 2), "VALID")
    y = jax.lax.conv_general_dilated(y, params["conv2_w"], (1, 1), "VALID",
                                     dimension_numbers=dn)
    y = jnp.maximum(y + params["conv2_b"][None, :, None, None], 0.0)
    y = jax.lax.reduce_window(y, -jnp.inf, jax.lax.max,
                              (1, 1, 2, 2), (1, 1, 2, 2), "VALID")
    y = y.reshape(y.shape[0], -1)                      # NCHW flatten == View((-1,400))
    y = jnp.maximum(y @ params["fc1_w"] + params["fc1_b"], 0.0)
    y = jnp.maximum(y @ params["fc2_w"] + params["fc2_b"], 0.0)
    return y @ params["fc3_w"] + params["fc3_b"]


if __name__ == "__main__":
    key = jax.random.PRNGKey(0)
    pkey, xkey = jax.random.split(key)
    n_classes = 10
    params = init_params(pkey, n_classes)
    packed = pack_params(params)           # packed ONCE, outside the forward
    # LeNet32's View((-1, 400)) requires 32x32x3 inputs; batch=2 (padded to bn=8).
    x = jax.random.normal(xkey, (2, 3, 32, 32), jnp.float32)

    fwd = jax.jit(lenet32_forward, static_argnames=("n_classes", "bn"))
    logits, activations = fwd(x, packed, n_classes=n_classes, bn=8)
    jax.block_until_ready(logits)

    assert logits.shape == (2, n_classes), logits.shape
    assert logits.dtype == jnp.float32
    assert activations is None

    # Numerical sanity check vs. a plain-JAX reference (bf16 MXU operands,
    # f32 accumulation -> small error is expected).
    ref = lenet32_reference(x, params)
    err = float(jnp.max(jnp.abs(logits - ref)))
    assert err < 2e-2, f"max|logits - reference| = {err}"
    print("KERNEL_OK")
</pallas_src>

<mosaic_0001>
module attributes {stable_mosaic.version = 11 : i64} {
  func.func @_lenet32_fused_kernel(%arg0: i32, %arg1: memref<128x256xf32, #tpu.memory_space<vmem>>, %arg2: memref<3x256x512xbf16, #tpu.memory_space<vmem>>, %arg3: memref<1x512xf32, #tpu.memory_space<vmem>>, %arg4: memref<640x256xbf16, #tpu.memory_space<vmem>>, %arg5: memref<1x256xf32, #tpu.memory_space<vmem>>, %arg6: memref<640x128xbf16, #tpu.memory_space<vmem>>, %arg7: memref<1x128xf32, #tpu.memory_space<vmem>>, %arg8: memref<128x128xbf16, #tpu.memory_space<vmem>>, %arg9: memref<1x128xf32, #tpu.memory_space<vmem>>, %arg10: memref<128x128xbf16, #tpu.memory_space<vmem>>, %arg11: memref<1x128xf32, #tpu.memory_space<vmem>>, %arg12: memref<8x128xf32, #tpu.memory_space<vmem>>) attributes {dimension_semantics = [#tpu.dimension_semantics<parallel>], iteration_bounds = array<i64: 1>, scalar_prefetch = 0 : i64, scratch_operands = 0 : i64, tpu.core_type = #tpu.core_type<tc>, window_params = [{transform_indices = @transform_0, window_bounds = array<i64: 128, 256>}, {pipeline_mode = #tpu.pipeline_mode<synchronous>, transform_indices = @transform_1, window_bounds = array<i64: 3, 256, 512>}, {pipeline_mode = #tpu.pipeline_mode<synchronous>, transform_indices = @transform_2, window_bounds = array<i64: 1, 512>}, {pipeline_mode = #tpu.pipeline_mode<synchronous>, transform_indices = @transform_3, window_bounds = array<i64: 640, 256>}, {pipeline_mode = #tpu.pipeline_mode<synchronous>, transform_indices = @transform_4, window_bounds = array<i64: 1, 256>}, {pipeline_mode = #tpu.pipeline_mode<synchronous>, transform_indices = @transform_5, window_bounds = array<i64: 640, 128>}, {pipeline_mode = #tpu.pipeline_mode<synchronous>, transform_indices = @transform_6, window_bounds = array<i64: 1, 128>}, {pipeline_mode = #tpu.pipeline_mode<synchronous>, transform_indices = @transform_7, window_bounds = array<i64: 128, 128>}, {pipeline_mode = #tpu.pipeline_mode<synchronous>, transform_indices = @transform_8, window_bounds = array<i64: 1, 128>}, {pipeline_mode = #tpu.pipeline_mode<synchronous>, transform_indices = @transform_9, window_bounds = array<i64: 128, 128>}, {pipeline_mode = #tpu.pipeline_mode<synchronous>, transform_indices = @transform_10, window_bounds = array<i64: 1, 128>}, {transform_indices = @transform_11, window_bounds = array<i64: 8, 128>}]} {
    %c0 = arith.constant 0 : index
    %c0_0 = arith.constant 0 : index
    %0 = vector.load %arg3[%c0, %c0_0] : memref<1x512xf32, #tpu.memory_space<vmem>>, vector<1x512xf32>
    %1 = vector.shape_cast %0 : vector<1x512xf32> to vector<1x512xf32>
    %2 = vector.broadcast %1 : vector<1x512xf32> to vector<112x512xf32>
    %c0_1 = arith.constant 0 : index
    %c0_2 = arith.constant 0 : index
    %3 = vector.load %arg1[%c0_1, %c0_2] : memref<128x256xf32, #tpu.memory_space<vmem>>, vector<112x256xf32>
    %4 = arith.truncf %3 : vector<112x256xf32> to vector<112x256xbf16>
    %c0_3 = arith.constant 0 : index
    %c0_4 = arith.constant 0 : index
    %c0_5 = arith.constant 0 : index
    %5 = vector.load %arg2[%c0_3, %c0_4, %c0_5] : memref<3x256x512xbf16, #tpu.memory_space<vmem>>, vector<1x256x512xbf16>
    %6 = vector.shape_cast %5 : vector<1x256x512xbf16> to vector<256x512xbf16>
    %cst = arith.constant dense<0.000000e+00> : vector<112x512xf32>
    %7 = tpu.matmul %4, %6, %cst {dimension_numbers = #tpu.dot_dimension_numbers<[1], [0], [0], [1], [0, 0, 1, 1], [], []>} : vector<112x256xbf16>, vector<256x512xbf16>, vector<112x512xf32> -> vector<112x512xf32>
    %8 = arith.addf %2, %7 : vector<112x512xf32>
    %c8 = arith.constant 8 : index
    %c0_6 = arith.constant 0 : index
    %9 = vector.load %arg1[%c8, %c0_6] : memref<128x256xf32, #tpu.memory_space<vmem>>, vector<112x256xf32>
    %10 = arith.truncf %9 : vector<112x256xf32> to vector<112x256xbf16>
    %c1 = arith.constant 1 : index
    %c0_7 = arith.constant 0 : index
    %c0_8 = arith.constant 0 : index
    %11 = vector.load %arg2[%c1, %c0_7, %c0_8] : memref<3x256x512xbf16, #tpu.memory_space<vmem>>, vector<1x256x512xbf16>
    %12 = vector.shape_cast %11 : vector<1x256x512xbf16> to vector<256x512xbf16>
    %cst_9 = arith.constant dense<0.000000e+00> : vector<112x512xf32>
    %13 = tpu.matmul %10, %12, %cst_9 {dimension_numbers = #tpu.dot_dimension_numbers<[1], [0], [0], [1], [0, 0, 1, 1], [], []>} : vector<112x256xbf16>, vector<256x512xbf16>, vector<112x512xf32> -> vector<112x512xf32>
    %14 = arith.addf %8, %13 : vector<112x512xf32>
    %c16 = arith.constant 16 : index
    %c0_10 = arith.constant 0 : index
    %15 = vector.load %arg1[%c16, %c0_10] : memref<128x256xf32, #tpu.memory_space<vmem>>, vector<112x256xf32>
    %16 = arith.truncf %15 : vector<112x256xf32> to vector<112x256xbf16>
    %c2 = arith.constant 2 : index
    %c0_11 = arith.constant 0 : index
    %c0_12 = arith.constant 0 : index
    %17 = vector.load %arg2[%c2, %c0_11, %c0_12] : memref<3x256x512xbf16, #tpu.memory_space<vmem>>, vector<1x256x512xbf16>
    %18 = vector.shape_cast %17 : vector<1x256x512xbf16> to vector<256x512xbf16>
    %cst_13 = arith.constant dense<0.000000e+00> : vector<112x512xf32>
    %19 = tpu.matmul %16, %18, %cst_13 {dimension_numbers = #tpu.dot_dimension_numbers<[1], [0], [0], [1], [0, 0, 1, 1], [], []>} : vector<112x256xbf16>, vector<256x512xbf16>, vector<112x512xf32> -> vector<112x512xf32>
    %20 = arith.addf %14, %19 : vector<112x512xf32>
    %cst_14 = arith.constant 0.000000e+00 : f32
    %21 = vector.broadcast %cst_14 : f32 to vector<112x512xf32>
    %22 = arith.maximumf %20, %21 : vector<112x512xf32>
    %23 = vector.extract_strided_slice %22 {offsets = [0, 0], sizes = [112, 128], strides = [1, 1]} : vector<112x512xf32> to vector<112x128xf32>
    %24 = vector.extract_strided_slice %22 {offsets = [0, 128], sizes = [112, 128], strides = [1, 1]} : vector<112x512xf32> to vector<112x128xf32>
    %25 = arith.maximumf %23, %24 : vector<112x128xf32>
    %26 = vector.extract_strided_slice %22 {offsets = [0, 256], sizes = [112, 128], strides = [1, 1]} : vector<112x512xf32> to vector<112x128xf32>
    %27 = vector.extract_strided_slice %22 {offsets = [0, 384], sizes = [112, 128], strides = [1, 1]} : vector<112x512xf32> to vector<112x128xf32>
    %28 = arith.maximumf %26, %27 : vector<112x128xf32>
    %29 = arith.maximumf %25, %28 : vector<112x128xf32>
    %30 = vector.extract_strided_slice %29 {offsets = [0, 0], sizes = [80, 128], strides = [1, 1]} : vector<112x128xf32> to vector<80x128xf32>
    %31 = vector.extract_strided_slice %29 {offsets = [8, 0], sizes = [80, 128], strides = [1, 1]} : vector<112x128xf32> to vector<80x128xf32>
    %32 = vector.extract_strided_slice %29 {offsets = [16, 0], sizes = [80, 128], strides = [1, 1]} : vector<112x128xf32> to vector<80x128xf32>
    %33 = vector.extract_strided_slice %29 {offsets = [24, 0], sizes = [80, 128], strides = [1, 1]} : vector<112x128xf32> to vector<80x128xf32>
    %34 = vector.extract_strided_slice %29 {offsets = [32, 0], sizes = [80, 128], strides = [1, 1]} : vector<112x128xf32> to vector<80x128xf32>
    %35 = tpu.concatenate %30, %31, %32, %33, %34 in 1 : vector<80x128xf32>, vector<80x128xf32>, vector<80x128xf32>, vector<80x128xf32>, vector<80x128xf32> -> vector<80x640xf32>
    %36 = arith.truncf %35 : vector<80x640xf32> to vector<80x640xbf16>
    %c0_15 = arith.constant 0 : index
    %c0_16 = arith.constant 0 : index
    %37 = vector.load %arg4[%c0_15, %c0_16] : memref<640x256xbf16, #tpu.memory_space<vmem>>, vector<640x256xbf16>
    %cst_17 = arith.constant dense<0.000000e+00> : vector<80x256xf32>
    %38 = tpu.matmul %36, %37, %cst_17 {dimension_numbers = #tpu.dot_dimension_numbers<[1], [0], [0], [1], [0, 0, 1, 1], [], []>} : vector<80x640xbf16>, vector<640x256xbf16>, vector<80x256xf32> -> vector<80x256xf32>
    %c0_18 = arith.constant 0 : index
    %c0_19 = arith.constant 0 : index
    %39 = vector.load %arg5[%c0_18, %c0_19] : memref<1x256xf32, #tpu.memory_space<vmem>>, vector<1x256xf32>
    %40 = vector.broadcast %39 : vector<1x256xf32> to vector<80x256xf32>
    %41 = arith.addf %38, %40 : vector<80x256xf32>
    %cst_20 = arith.constant 0.000000e+00 : f32
    %42 = vector.broadcast %cst_20 : f32 to vector<80x256xf32>
    %43 = arith.maximumf %41, %42 : vector<80x256xf32>
    %44 = vector.extract_strided_slice %43 {offsets = [0, 0], sizes = [80, 128], strides = [1, 1]} : vector<80x256xf32> to vector<80x128xf32>
    %45 = vector.extract_strided_slice %43 {offsets = [0, 128], sizes = [80, 128], strides = [1, 1]} : vector<80x256xf32> to vector<80x128xf32>
    %46 = arith.maximumf %44, %45 : vector<80x128xf32>
    %47 = vector.extract_strided_slice %46 {offsets = [0, 0], sizes = [8, 128], strides = [1, 1]} : vector<80x128xf32> to vector<8x128xf32>
    %48 = vector.extract_strided_slice %46 {offsets = [8, 0], sizes = [8, 128], strides = [1, 1]} : vector<80x128xf32> to vector<8x128xf32>
    %49 = arith.maximumf %47, %48 : vector<8x128xf32>
    %50 = vector.extract_strided_slice %46 {offsets = [16, 0], sizes = [8, 128], strides = [1, 1]} : vector<80x128xf32> to vector<8x128xf32>
    %51 = vector.extract_strided_slice %46 {offsets = [24, 0], sizes = [8, 128], strides = [1, 1]} : vector<80x128xf32> to vector<8x128xf32>
    %52 = arith.maximumf %50, %51 : vector<8x128xf32>
    %53 = vector.extract_strided_slice %46 {offsets = [32, 0], sizes = [8, 128], strides = [1, 1]} : vector<80x128xf32> to vector<8x128xf32>
    %54 = vector.extract_strided_slice %46 {offsets = [40, 0], sizes = [8, 128], strides = [1, 1]} : vector<80x128xf32> to vector<8x128xf32>
    %55 = arith.maximumf %53, %54 : vector<8x128xf32>
    %56 = vector.extract_strided_slice %46 {offsets = [48, 0], sizes = [8, 128], strides = [1, 1]} : vector<80x128xf32> to vector<8x128xf32>
    %57 = vector.extract_strided_slice %46 {offsets = [56, 0], sizes = [8, 128], strides = [1, 1]} : vector<80x128xf32> to vector<8x128xf32>
    %58 = arith.maximumf %56, %57 : vector<8x128xf32>
    %59 = vector.extract_strided_slice %46 {offsets = [64, 0], sizes = [8, 128], strides = [1, 1]} : vector<80x128xf32> to vector<8x128xf32>
    %60 = vector.extract_strided_slice %46 {offsets = [72, 0], sizes = [8, 128], strides = [1, 1]} : vector<80x128xf32> to vector<8x128xf32>
    %61 = arith.maximumf %59, %60 : vector<8x128xf32>
    %62 = tpu.concatenate %49, %52, %55, %58, %61 in 1 : vector<8x128xf32>, vector<8x128xf32>, vector<8x128xf32>, vector<8x128xf32>, vector<8x128xf32> -> vector<8x640xf32>
    %63 = arith.truncf %62 : vector<8x640xf32> to vector<8x640xbf16>
    %c0_21 = arith.constant 0 : index
    %c0_22 = arith.constant 0 : index
    %64 = vector.load %arg6[%c0_21, %c0_22] : memref<640x128xbf16, #tpu.memory_space<vmem>>, vector<640x128xbf16>
    %cst_23 = arith.constant dense<0.000000e+00> : vector<8x128xf32>
    %65 = tpu.matmul %63, %64, %cst_23 {dimension_numbers = #tpu.dot_dimension_numbers<[1], [0], [0], [1], [0, 0, 1, 1], [], []>} : vector<8x640xbf16>, vector<640x128xbf16>, vector<8x128xf32> -> vector<8x128xf32>
    %c0_24 = arith.constant 0 : index
    %c0_25 = arith.constant 0 : index
    %66 = vector.load %arg7[%c0_24, %c0_25] : memref<1x128xf32, #tpu.memory_space<vmem>>, vector<1x128xf32>
    %67 = vector.broadcast %66 : vector<1x128xf32> to vector<8x128xf32>
    %68 = arith.addf %65, %67 : vector<8x128xf32>
    %cst_26 = arith.constant 0.000000e+00 : f32
    %69 = vector.broadcast %cst_26 : f32 to vector<8x128xf32>
    %70 = arith.maximumf %68, %69 : vector<8x128xf32>
    %71 = arith.truncf %70 : vector<8x128xf32> to vector<8x128xbf16>
    %c0_27 = arith.constant 0 : index
    %c0_28 = arith.constant 0 : index
    %72 = vector.load %arg8[%c0_27, %c0_28] : memref<128x128xbf16, #tpu.memory_space<vmem>>, vector<128x128xbf16>
    %cst_29 = arith.constant dense<0.000000e+00> : vector<8x128xf32>
    %73 = tpu.matmul %71, %72, %cst_29 {dimension_numbers = #tpu.dot_dimension_numbers<[1], [0], [0], [1], [0, 0, 1, 1], [], []>} : vector<8x128xbf16>, vector<128x128xbf16>, vector<8x128xf32> -> vector<8x128xf32>
    %c0_30 = arith.constant 0 : index
    %c0_31 = arith.constant 0 : index
    %74 = vector.load %arg9[%c0_30, %c0_31] : memref<1x128xf32, #tpu.memory_space<vmem>>, vector<1x128xf32>
    %75 = vector.broadcast %74 : vector<1x128xf32> to vector<8x128xf32>
    %76 = arith.addf %73, %75 : vector<8x128xf32>
    %cst_32 = arith.constant 0.000000e+00 : f32
    %77 = vector.broadcast %cst_32 : f32 to vector<8x128xf32>
    %78 = arith.maximumf %76, %77 : vector<8x128xf32>
    %79 = arith.truncf %78 : vector<8x128xf32> to vector<8x128xbf16>
    %c0_33 = arith.constant 0 : index
    %c0_34 = arith.constant 0 : index
    %80 = vector.load %arg10[%c0_33, %c0_34] : memref<128x128xbf16, #tpu.memory_space<vmem>>, vector<128x128xbf16>
    %cst_35 = arith.constant dense<0.000000e+00> : vector<8x128xf32>
    %81 = tpu.matmul %79, %80, %cst_35 {dimension_numbers = #tpu.dot_dimension_numbers<[1], [0], [0], [1], [0, 0, 1, 1], [], []>} : vector<8x128xbf16>, vector<128x128xbf16>, vector<8x128xf32> -> vector<8x128xf32>
    %c0_36 = arith.constant 0 : index
    %c0_37 = arith.constant 0 : index
    %82 = vector.load %arg11[%c0_36, %c0_37] : memref<1x128xf32, #tpu.memory_space<vmem>>, vector<1x128xf32>
    %83 = vector.broadcast %82 : vector<1x128xf32> to vector<8x128xf32>
    %84 = arith.addf %81, %83 : vector<8x128xf32>
    %c0_38 = arith.constant 0 : index
    %c0_39 = arith.constant 0 : index
    %85 = vector.load %arg12[%c0_38, %c0_39] : memref<8x128xf32, #tpu.memory_space<vmem>>, vector<8x128xf32>
    tpu.vector_store %arg12[%c0_38, %c0_39], %84 {strides = array<i32>} : memref<8x128xf32, #tpu.memory_space<vmem>>, vector<8x128xf32>,
    return
  }
  func.func @transform_0(%arg0: i32) -> (i32, i32) {
    %c0_i32 = arith.constant 0 : i32
    %c0_i32_0 = arith.constant 0 : i32
    return %arg0, %c0_i32 : i32, i32
  }
  func.func @transform_1(%arg0: i32) -> (i32, i32, i32) {
    %c0_i32 = arith.constant 0 : i32
    %c0_i32_0 = arith.constant 0 : i32
    %c0_i32_1 = arith.constant 0 : i32
    %c0_i32_2 = arith.constant 0 : i32
    return %c0_i32, %c0_i32_0, %c0_i32_1 : i32, i32, i32
  }
  func.func @transform_2(%arg0: i32) -> (i32, i32) {
    %c0_i32 = arith.constant 0 : i32
    %c0_i32_0 = arith.constant 0 : i32
    %c0_i32_1 = arith.constant 0 : i32
    return %c0_i32, %c0_i32_0 : i32, i32
  }
  func.func @transform_3(%arg0: i32) -> (i32, i32) {
    %c0_i32 = arith.constant 0 : i32
    %c0_i32_0 = arith.constant 0 : i32
    %c0_i32_1 = arith.constant 0 : i32
    return %c0_i32, %c0_i32_0 : i32, i32
  }
  func.func @transform_4(%arg0: i32) -> (i32, i32) {
    %c0_i32 = arith.constant 0 : i32
    %c0_i32_0 = arith.constant 0 : i32
    %c0_i32_1 = arith.constant 0 : i32
    return %c0_i32, %c0_i32_0 : i32, i32
  }
  func.func @transform_5(%arg0: i32) -> (i32, i32) {
    %c0_i32 = arith.constant 0 : i32
    %c0_i32_0 = arith.constant 0 : i32
    %c0_i32_1 = arith.constant 0 : i32
    return %c0_i32, %c0_i32_0 : i32, i32
  }
  func.func @transform_6(%arg0: i32) -> (i32, i32) {
    %c0_i32 = arith.constant 0 : i32
    %c0_i32_0 = arith.constant 0 : i32
    %c0_i32_1 = arith.constant 0 : i32
    return %c0_i32, %c0_i32_0 : i32, i32
  }
  func.func @transform_7(%arg0: i32) -> (i32, i32) {
    %c0_i32 = arith.constant 0 : i32
    %c0_i32_0 = arith.constant 0 : i32
    %c0_i32_1 = arith.constant 0 : i32
    return %c0_i32, %c0_i32_0 : i32, i32
  }
  func.func @transform_8(%arg0: i32) -> (i32, i32) {
    %c0_i32 = arith.constant 0 : i32
    %c0_i32_0 = arith.constant 0 : i32
    %c0_i32_1 = arith.constant 0 : i32
    return %c0_i32, %c0_i32_0 : i32, i32
  }
  func.func @transform_9(%arg0: i32) -> (i32, i32) {
    %c0_i32 = arith.constant 0 : i32
    %c0_i32_0 = arith.constant 0 : i32
    %c0_i32_1 = arith.constant 0 : i32
    return %c0_i32, %c0_i32_0 : i32, i32
  }
  func.func @transform_10(%arg0: i32) -> (i32, i32) {
    %c0_i32 = arith.constant 0 : i32
    %c0_i32_0 = arith.constant 0 : i32
    %c0_i32_1 = arith.constant 0 : i32
    return %c0_i32, %c0_i32_0 : i32, i32
  }
  func.func @transform_11(%arg0: i32) -> (i32, i32) {
    %c0_i32 = arith.constant 0 : i32
    %c0_i32_0 = arith.constant 0 : i32
    return %arg0, %c0_i32 : i32, i32
  }
}

</mosaic_0001>

<bundles_post_ra>
// kernel: lenet32_forward.1
= control target key start
LH: loop header
LB: loop body
LE: loop exit
PB: predicated region body
PF: predicated region fallthrough
CT: control target
= control target key end

     0   :  { %vm4984_vm0 = vmmov 0   ;;  %s6509_s1 = inlined_call_operand.vmem [shape: bf16[3,256,512], index: 1, kind: input, shape index: {}]   ;;  %s6510_s0 = inlined_call_operand.vmem [shape: f32[128,256], index: 0, kind: input, shape index: {}]   ;;  %s6511_s3 = inlined_call_operand.vmem [shape: bf16[640,256], index: 3, kind: input, shape index: {}]   ;;  %s6512_s2 = inlined_call_operand.vmem [shape: f32[1,512], index: 2, kind: input, shape index: {}]   ;;  %s6513_s5 = inlined_call_operand.vmem [shape: bf16[640,128], index: 5, kind: input, shape index: {}]   ;;  %s6514_s4 = inlined_call_operand.vmem [shape: f32[1,256], index: 4, kind: input, shape index: {}]   ;;  %s6515_s7 = inlined_call_operand.vmem [shape: bf16[128,128], index: 7, kind: input, shape index: {}]   ;;  %s6516_s9 = inlined_call_operand.vmem [shape: bf16[128,128], index: 9, kind: input, shape index: {}]   ;;  %s6517_s6 = inlined_call_operand.vmem [shape: f32[1,128], index: 6, kind: input, shape index: {}]   ;;  %s6518_s8 = inlined_call_operand.vmem [shape: f32[1,128], index: 8, kind: input, shape index: {}]   ;;  %s6519_s10 = inlined_call_operand.vmem [shape: f32[1,128], index: 10, kind: input, shape index: {}]   ;;  %s6520_s11 = inlined_call_operand.vmem [shape: f32[8,128], index: 11, kind: output, shape index: {}]  }
   0x1   :  { %v4518_v0 = vld [vmem:[%s6509_s1 + $0x4] ss:$16 sps:$4 sm:$0xff]   ;;  %v4520_v1 = vld [vmem:[%s6509_s1 + $0xc] ss:$16 sps:$4 sm:$0xff]   ;;  %v4522_v2 = vld [vmem:[%s6509_s1] ss:$16 sps:$4 sm:$0xff]  }
   0x2   :  { %487 = vmatprep.subr.bf16.mxu0 %v4518_v0  ;;  %v4523_v3 = vld [vmem:[%s6509_s1 + $0x8] ss:$16 sps:$4 sm:$0xff]   ;;  %590 = vmatprep.subr.bf16.mxu1 %v4520_v1  ;;  %v4524_v4 = vld [vmem:[%s6509_s1 + $0x24] ss:$16 sps:$4 sm:$0xff]   ;;  %v4526_v5 = vld [vmem:[%s6509_s1 + $0x2c] ss:$16 sps:$4 sm:$0xff]  }
   0x3   :  { %488 = vmatpush1.bf16.msra.mxu0 %v4522_v2  ;;  %591 = vmatpush1.bf16.msra.mxu1 %v4523_v3  ;;  %v4528_v6 = vld [vmem:[%s6509_s1 + $0x20] ss:$16 sps:$4 sm:$0xff]   ;;  %v4529_v7 = vld [vmem:[%s6509_s1 + $0x28] ss:$16 sps:$4 sm:$0xff]   ;;  %v4530_v8 = vld [vmem:[%s6509_s1 + $0x44] ss:$16 sps:$4 sm:$0xff]  }
   0x4   :  { %489 = vmatprep.subr.bf16.mxu0 %v4524_v4  ;;  %592 = vmatprep.subr.bf16.mxu1 %v4526_v5  ;;  %v4532_v9 = vld [vmem:[%s6509_s1 + $0x4c] ss:$16 sps:$4 sm:$0xff]   ;;  %v4534_v10 = vld [vmem:[%s6509_s1 + $0x40] ss:$16 sps:$4 sm:$0xff]   ;;  %v4535_v11 = vld [vmem:[%s6509_s1 + $0x48] ss:$16 sps:$4 sm:$0xff]  }
   0x5   :  { %v4536_v12 = vld [vmem:[%s6509_s1 + $0x64] ss:$16 sps:$4 sm:$0xff]   ;;  %v4538_v13 = vld [vmem:[%s6509_s1 + $0x6c] ss:$16 sps:$4 sm:$0xff]   ;;  %v4540_v14 = vld [vmem:[%s6509_s1 + $0x60] ss:$16 sps:$4 sm:$0xff]  }
   0x6   :  { %v4541_v15 = vld [vmem:[%s6509_s1 + $0x68] ss:$16 sps:$4 sm:$0xff]   ;;  %v4542_v16 = vld [vmem:[%s6509_s1 + $0x84] ss:$16 sps:$4 sm:$0xff]   ;;  %v4544_v17 = vld [vmem:[%s6509_s1 + $0x8c] ss:$16 sps:$4 sm:$0xff]  }
   0x7   :  { %490 = vmatpush1.bf16.msra.mxu0 %v4528_v6  ;;  %593 = vmatpush1.bf16.msra.mxu1 %v4529_v7  ;;  %v4546_v18 = vld [vmem:[%s6509_s1 + $0x80] ss:$16 sps:$4 sm:$0xff]   ;;  %v4547_v19 = vld [vmem:[%s6509_s1 + $0x88] ss:$16 sps:$4 sm:$0xff]   ;;  %v4548_v20 = vld [vmem:[%s6509_s1 + $0xa4] ss:$16 sps:$4 sm:$0xff]  }
   0x8   :  { %491 = vmatprep.subr.bf16.mxu0 %v4530_v8  ;;  %594 = vmatprep.subr.bf16.mxu1 %v4532_v9  ;;  %v4550_v21 = vld [vmem:[%s6509_s1 + $0xac] ss:$16 sps:$4 sm:$0xff]   ;;  %v4552_v22 = vld [vmem:[%s6509_s1 + $0xa0] ss:$16 sps:$4 sm:$0xff]   ;;  %v4553_v23 = vld [vmem:[%s6509_s1 + $0xa8] ss:$16 sps:$4 sm:$0xff]  }
   0x9   :  { %v4554_v24 = vld [vmem:[%s6509_s1 + $0xc4] ss:$16 sps:$4 sm:$0xff]   ;;  %v4556_v25 = vld [vmem:[%s6509_s1 + $0xcc] ss:$16 sps:$4 sm:$0xff]   ;;  %v4558_v26 = vld [vmem:[%s6509_s1 + $0xc0] ss:$16 sps:$4 sm:$0xff]  }
   0xa   :  { %v4559_v27 = vld [vmem:[%s6509_s1 + $0xc8] ss:$16 sps:$4 sm:$0xff]   ;;  %v4560_v28 = vld [vmem:[%s6509_s1 + $0xe4] ss:$16 sps:$4 sm:$0xff]   ;;  %v4562_v29 = vld [vmem:[%s6509_s1 + $0xec] ss:$16 sps:$4 sm:$0xff]  }
   0xb   :  { %492 = vmatpush1.bf16.msra.mxu0 %v4534_v10  ;;  %595 = vmatpush1.bf16.msra.mxu1 %v4535_v11  ;;  %v4564_v30 = vld [vmem:[%s6509_s1 + $0xe0] ss:$16 sps:$4 sm:$0xff]   ;;  %v4565_v31 = vld [vmem:[%s6509_s1 + $0xe8] ss:$16 sps:$4 sm:$0xff]   ;;  %v4566_v32 = vld [vmem:[%s6509_s1 + $0x104] ss:$16 sps:$4 sm:$0xff]  }
   0xc   :  { %493 = vmatprep.subr.bf16.mxu0 %v4536_v12  ;;  %596 = vmatprep.subr.bf16.mxu1 %v4538_v13  ;;  %v4568_v33 = vld [vmem:[%s6509_s1 + $0x10c] ss:$16 sps:$4 sm:$0xff]   ;;  %v4570_v34 = vld [vmem:[%s6509_s1 + $0x100] ss:$16 sps:$4 sm:$0xff]   ;;  %v4571_v35 = vld [vmem:[%s6509_s1 + $0x108] ss:$16 sps:$4 sm:$0xff]  }
   0xd   :  { %v4572_v36 = vld [vmem:[%s6509_s1 + $0x124] ss:$16 sps:$4 sm:$0xff]   ;;  %v4574_v37 = vld [vmem:[%s6509_s1 + $0x12c] ss:$16 sps:$4 sm:$0xff]   ;;  %v4576_v38 = vld [vmem:[%s6509_s1 + $0x120] ss:$16 sps:$4 sm:$0xff]  }
   0xe   :  { %v4577_v39 = vld [vmem:[%s6509_s1 + $0x128] ss:$16 sps:$4 sm:$0xff]   ;;  %v4578_v40 = vld [vmem:[%s6509_s1 + $0x144] ss:$16 sps:$4 sm:$0xff]   ;;  %v4580_v41 = vld [vmem:[%s6509_s1 + $0x14c] ss:$16 sps:$4 sm:$0xff]  }
   0xf   :  { %494 = vmatpush1.bf16.msra.mxu0 %v4540_v14  ;;  %597 = vmatpush1.bf16.msra.mxu1 %v4541_v15  ;;  %v4582_v42 = vld [vmem:[%s6509_s1 + $0x140] ss:$16 sps:$4 sm:$0xff]   ;;  %v4583_v43 = vld [vmem:[%s6509_s1 + $0x148] ss:$16 sps:$4 sm:$0xff]   ;;  %v4584_v44 = vld [vmem:[%s6509_s1 + $0x164] ss:$16 sps:$4 sm:$0xff]  }
  0x10   :  { %495 = vmatprep.subr.bf16.mxu0 %v4542_v16  ;;  %598 = vmatprep.subr.bf16.mxu1 %v4544_v17  ;;  %v4586_v45 = vld [vmem:[%s6509_s1 + $0x16c] ss:$16 sps:$4 sm:$0xff]   ;;  %v4588_v48 = vld [vmem:[%s6509_s1 + $0x160] ss:$16 sps:$4 sm:$0xff]   ;;  %v4589_v49 = vld [vmem:[%s6509_s1 + $0x168] ss:$16 sps:$4 sm:$0xff]  }
  0x11   :  { %v62_v46 = vld [vmem:[%s6510_s0 + $0x8] sm:$0xff]  ;;  %v5189_v47 = vld [vmem:[%s6510_s0 + $0x18] sm:$0xff]  ;;  %v4590_v51 = vld [vmem:[%s6509_s1 + $0x184] ss:$16 sps:$4 sm:$0xff]  }
  0x12   :  { %v90_v50 = vpack.c.bf16 %v5189_v47, %v62_v46  ;;  %v4592_v52 = vld [vmem:[%s6509_s1 + $0x18c] ss:$16 sps:$4 sm:$0xff]   ;;  %v4594_v53 = vld [vmem:[%s6509_s1 + $0x180] ss:$16 sps:$4 sm:$0xff]   ;;  %v4595_v54 = vld [vmem:[%s6509_s1 + $0x188] ss:$16 sps:$4 sm:$0xff]  }
  0x13   :  { %496 = vmatpush1.bf16.msra.mxu0 %v4546_v18  ;;  %599 = vmatpush1.bf16.msra.mxu1 %v4547_v19  ;;  %v4596_v55 = vld [vmem:[%s6509_s1 + $0x1a4] ss:$16 sps:$4 sm:$0xff]   ;;  %v4598_v56 = vld [vmem:[%s6509_s1 + $0x1ac] ss:$16 sps:$4 sm:$0xff]   ;;  %v4600_v57 = vld [vmem:[%s6509_s1 + $0x1a0] ss:$16 sps:$4 sm:$0xff]  }
  0x14   :  { %497 = vmatprep.subr.bf16.mxu0 %v4548_v20  ;;  %600 = vmatprep.subr.bf16.mxu1 %v4550_v21  ;;  %v4601_v58 = vld [vmem:[%s6509_s1 + $0x1a8] ss:$16 sps:$4 sm:$0xff]   ;;  %v4602_v59 = vld [vmem:[%s6509_s1 + $0x1c4] ss:$16 sps:$4 sm:$0xff]   ;;  %v4604_v60 = vld [vmem:[%s6509_s1 + $0x1cc] ss:$16 sps:$4 sm:$0xff]  }
  0x15   :  { %519 = vmatprep.mubr.bf16.mxu0 %v90_v50  ;;  %622 = vmatprep.mubr.bf16.mxu1 %v90_v50  ;;  %v4606_v61 = vld [vmem:[%s6509_s1 + $0x1c0] ss:$16 sps:$4 sm:$0xff]   ;;  %v4607_v62 = vld [vmem:[%s6509_s1 + $0x1c8] ss:$16 sps:$4 sm:$0xff]   ;;  %v4608_v63 = vld [vmem:[%s6509_s1 + $0x1e4] ss:$16 sps:$4 sm:$0xff]  }
  0x16   :  { %v4610_v0 = vld [vmem:[%s6509_s1 + $0x1ec] ss:$16 sps:$4 sm:$0xff]   ;;  %v4612_v1 = vld [vmem:[%s6509_s1 + $0x1e0] ss:$16 sps:$4 sm:$0xff]   ;;  %v4613_v2 = vld [vmem:[%s6509_s1 + $0x1e8] ss:$16 sps:$4 sm:$0xff]  }
  0x17   :  { %498 = vmatpush1.bf16.msra.mxu0 %v4552_v22  ;;  %601 = vmatpush1.bf16.msra.mxu1 %v4553_v23  ;;  %v61_v3 = vld [vmem:[%s6510_s0] sm:$0xff]  ;;  %v5252_v4 = vld [vmem:[%s6510_s0 + $0x10] sm:$0xff]  ;;  %v4619_v6 = vld [vmem:[%s6509_s1 + $0x20c] ss:$16 sps:$4 sm:$0xff]  }
  0x18   :  { %499 = vmatprep.subr.bf16.mxu0 %v4554_v24  ;;  %602 = vmatprep.subr.bf16.mxu1 %v4556_v25  ;;  %v4616_v5 = vld [vmem:[%s6509_s1 + $0x204] ss:$16 sps:$4 sm:$0xff]   ;;  %v5263_v7 = vld [vmem:[%s6510_s0 + $0x28] sm:$0xff]  ;;  %v89_v8 = vpack.c.bf16 %v5252_v4, %v61_v3  ;;  %v5269_v9 = vld [vmem:[%s6510_s0 + $0x38] sm:$0xff] }
  0x19   :  { %v4614_v10 = vld [vmem:[%s6509_s1 + $0x200] ss:$16 sps:$4 sm:$0xff]   ;;  %v4617_v11 = vld [vmem:[%s6509_s1 + $0x208] ss:$16 sps:$4 sm:$0xff]   ;;  %v4622_v12 = vld [vmem:[%s6509_s1 + $0x224] ss:$16 sps:$4 sm:$0xff]   ;;  %v5285_v14 = vpack.c.bf16 %v5269_v9, %v5263_v7 }
  0x1a   :  { %v4625_v13 = vld [vmem:[%s6509_s1 + $0x22c] ss:$16 sps:$4 sm:$0xff]   ;;  %v4620_v15 = vld [vmem:[%s6509_s1 + $0x220] ss:$16 sps:$4 sm:$0xff]   ;;  %v4623_v16 = vld [vmem:[%s6509_s1 + $0x228] ss:$16 sps:$4 sm:$0xff]  }
  0x1b   :  { %500 = vmatpush1.bf16.msra.mxu0 %v4558_v26  ;;  %603 = vmatpush1.bf16.msra.mxu1 %v4559_v27  ;;  %v5296_v17 = vld [vmem:[%s6510_s0 + $0x20] sm:$0xff]  ;;  %v5301_v18 = vld [vmem:[%s6510_s0 + $0x30] sm:$0xff]  ;;  %v4631_v20 = vld [vmem:[%s6509_s1 + $0x24c] ss:$16 sps:$4 sm:$0xff]  }
  0x1c   :  { %501 = vmatprep.subr.bf16.mxu0 %v4560_v28  ;;  %604 = vmatprep.subr.bf16.mxu1 %v4562_v29  ;;  %v4628_v19 = vld [vmem:[%s6509_s1 + $0x244] ss:$16 sps:$4 sm:$0xff]   ;;  %v4626_v21 = vld [vmem:[%s6509_s1 + $0x240] ss:$16 sps:$4 sm:$0xff]   ;;  %v4629_v22 = vld [vmem:[%s6509_s1 + $0x248] ss:$16 sps:$4 sm:$0xff]   ;;  %v5319_v23 = vpack.c.bf16 %v5301_v18, %v5296_v17 }
  0x1d   :  { %v5324_v24 = vld [vmem:[%s6510_s0 + $0x48] sm:$0xff]  ;;  %v5329_v25 = vld [vmem:[%s6510_s0 + $0x58] sm:$0xff]  ;;  %v4634_v26 = vld [vmem:[%s6509_s1 + $0x264] ss:$16 sps:$4 sm:$0xff]  }
  0x1e   :  { %v4637_v27 = vld [vmem:[%s6509_s1 + $0x26c] ss:$16 sps:$4 sm:$0xff]   ;;  %v4632_v28 = vld [vmem:[%s6509_s1 + $0x260] ss:$16 sps:$4 sm:$0xff]   ;;  %v5342_v29 = vpack.c.bf16 %v5329_v25, %v5324_v24 }
  0x1f   :  { %502 = vmatpush1.bf16.msra.mxu0 %v4564_v30  ;;  %605 = vmatpush1.bf16.msra.mxu1 %v4565_v31  ;;  %v4635_v30 = vld [vmem:[%s6509_s1 + $0x268] ss:$16 sps:$4 sm:$0xff]   ;;  %v5352_v31 = vld [vmem:[%s6510_s0 + $0x40] sm:$0xff] }
  0x20   :  { %503 = vmatprep.subr.bf16.mxu0 %v4566_v32  ;;  %606 = vmatprep.subr.bf16.mxu1 %v4568_v33  ;;  %v5357_v32 = vld [vmem:[%s6510_s0 + $0x50] sm:$0xff]  ;;  %v5411_v46 = vld [vmem:[%s6510_s0 + $0x60] sm:$0xff]  ;;  %v5492_v3 = vld [vmem:[%s6510_s0 + $0xa8] sm:$0xff] }
  0x21   :  { %v4640_v33 = vld [vmem:[%s6509_s1 + $0x284] ss:$16 sps:$4 sm:$0xff]  }
  0x23   :  { %504 = vmatpush1.bf16.msra.mxu0 %v4570_v34  ;;  %607 = vmatpush1.bf16.msra.mxu1 %v4571_v35  ;;  %v4643_v34 = vld [vmem:[%s6509_s1 + $0x28c] ss:$16 sps:$4 sm:$0xff]   ;;  %v4638_v35 = vld [vmem:[%s6509_s1 + $0x280] ss:$16 sps:$4 sm:$0xff]  }
  0x24   :  { %505 = vmatprep.subr.bf16.mxu0 %v4572_v36  ;;  %608 = vmatprep.subr.bf16.mxu1 %v4574_v37  ;;  %v5372_v36 = vpack.c.bf16 %v5357_v32, %v5352_v31  ;;  %v5377_v37 = vld [vmem:[%s6510_s0 + $0x68] sm:$0xff] }
  0x27   :  { %506 = vmatpush1.bf16.msra.mxu0 %v4576_v38  ;;  %609 = vmatpush1.bf16.msra.mxu1 %v4577_v39  ;;  %v5382_v38 = vld [vmem:[%s6510_s0 + $0x78] sm:$0xff] }
  0x28   :  { %507 = vmatprep.subr.bf16.mxu0 %v4578_v40  ;;  %610 = vmatprep.subr.bf16.mxu1 %v4580_v41  ;;  %v4641_v39 = vld [vmem:[%s6509_s1 + $0x288] ss:$16 sps:$4 sm:$0xff]   ;;  %v4646_v40 = vld [vmem:[%s6509_s1 + $0x2a4] ss:$16 sps:$4 sm:$0xff]   ;;  %v4649_v41 = vld [vmem:[%s6509_s1 + $0x2ac] ss:$16 sps:$4 sm:$0xff]  }
  0x2b   :  { %508 = vmatpush1.bf16.msra.mxu0 %v4582_v42  ;;  %611 = vmatpush1.bf16.msra.mxu1 %v4583_v43  ;;  %v4644_v42 = vld [vmem:[%s6509_s1 + $0x2a0] ss:$16 sps:$4 sm:$0xff]   ;;  %v5398_v43 = vpack.c.bf16 %v5382_v38, %v5377_v37 }
  0x2c   :  { %509 = vmatprep.subr.bf16.mxu0 %v4584_v44  ;;  %612 = vmatprep.subr.bf16.mxu1 %v4586_v45  ;;  %v4647_v44 = vld [vmem:[%s6509_s1 + $0x2a8] ss:$16 sps:$4 sm:$0xff]   ;;  %v4652_v45 = vld [vmem:[%s6509_s1 + $0x2c4] ss:$16 sps:$4 sm:$0xff]  }
  0x2f   :  { %510 = vmatpush1.bf16.msra.mxu0 %v4588_v48  ;;  %613 = vmatpush1.bf16.msra.mxu1 %v4589_v49  ;;  %v5416_v48 = vld [vmem:[%s6510_s0 + $0x70] sm:$0xff]  ;;  %v4655_v49 = vld [vmem:[%s6509_s1 + $0x2cc] ss:$16 sps:$4 sm:$0xff]  }
  0x30   :  { %511 = vmatprep.subr.bf16.mxu0 %v4590_v51  ;;  %614 = vmatprep.subr.bf16.mxu1 %v4592_v52  ;;  %v5425_v50 = vpack.c.bf16 %v5416_v48, %v5411_v46  ;;  %v5430_v51 = vld [vmem:[%s6510_s0 + $0x88] sm:$0xff]  ;;  %v5435_v52 = vld [vmem:[%s6510_s0 + $0x98] sm:$0xff] }
  0x33   :  { %512 = vmatpush1.bf16.msra.mxu0 %v4594_v53  ;;  %615 = vmatpush1.bf16.msra.mxu1 %v4595_v54  ;;  %v4650_v53 = vld [vmem:[%s6509_s1 + $0x2c0] ss:$16 sps:$4 sm:$0xff]   ;;  %v4653_v54 = vld [vmem:[%s6509_s1 + $0x2c8] ss:$16 sps:$4 sm:$0xff]  }
  0x34   :  { %513 = vmatprep.subr.bf16.mxu0 %v4596_v55  ;;  %616 = vmatprep.subr.bf16.mxu1 %v4598_v56  ;;  %v4658_v55 = vld [vmem:[%s6509_s1 + $0x2e4] ss:$16 sps:$4 sm:$0xff]   ;;  %v4661_v56 = vld [vmem:[%s6509_s1 + $0x2ec] ss:$16 sps:$4 sm:$0xff]  }
  0x37   :  { %514 = vmatpush1.bf16.msra.mxu0 %v4600_v57  ;;  %617 = vmatpush1.bf16.msra.mxu1 %v4601_v58  ;;  %v4656_v57 = vld [vmem:[%s6509_s1 + $0x2e0] ss:$16 sps:$4 sm:$0xff]   ;;  %v5454_v58 = vpack.c.bf16 %v5435_v52, %v5430_v51 }
  0x38   :  { %515 = vmatprep.subr.bf16.mxu0 %v4602_v59  ;;  %618 = vmatprep.subr.bf16.mxu1 %v4604_v60  ;;  %v4659_v59 = vld [vmem:[%s6509_s1 + $0x2e8] ss:$16 sps:$4 sm:$0xff]   ;;  %v4664_v60 = vld [vmem:[%s6509_s1 + $0x304] ss:$16 sps:$4 sm:$0xff]  }
  0x3b   :  { %516 = vmatpush1.bf16.msra.mxu0 %v4606_v61  ;;  %619 = vmatpush1.bf16.msra.mxu1 %v4607_v62  ;;  %v5467_v61 = vld [vmem:[%s6510_s0 + $0x80] sm:$0xff]  ;;  %v5472_v62 = vld [vmem:[%s6510_s0 + $0x90] sm:$0xff] }
  0x3c   :  { %517 = vmatprep.subr.bf16.mxu0 %v4608_v63  ;;  %620 = vmatprep.subr.bf16.mxu1 %v4610_v0  ;;  %v4667_v63 = vld [vmem:[%s6509_s1 + $0x30c] ss:$16 sps:$4 sm:$0xff]   ;;  %v4662_v0 = vld [vmem:[%s6509_s1 + $0x300] ss:$16 sps:$4 sm:$0xff]  }
  0x3f   :  { %518 = vmatpush1.bf16.msra.mxu0 %v4612_v1  ;;  %621 = vmatpush1.bf16.msra.mxu1 %v4613_v2  ;;  %v4665_v1 = vld [vmem:[%s6509_s1 + $0x308] ss:$16 sps:$4 sm:$0xff]   ;;  %v5487_v2 = vpack.c.bf16 %v5472_v62, %v5467_v61 }
  0x40   :  { %1176 = vmatprep.subr.bf16.mxu0 %v4616_v5  ;;  %1279 = vmatprep.subr.bf16.mxu1 %v4619_v6  ;;  %v5497_v5 = vld [vmem:[%s6510_s0 + $0xb8] sm:$0xff]  ;;  %v4670_v6 = vld [vmem:[%s6509_s1 + $0x324] ss:$16 sps:$4 sm:$0xff]  }
  0x42   :  { %520 = vmatmul.mubr.bf16.vlgmr.msra.gmra.mrb[0].mxu0 %v89_v8  ;;  %623 = vmatmul.mubr.bf16.vlgmr.msra.gmra.mrb[0].mxu1 %v89_v8  ;;  %v4673_v8 = vld [vmem:[%s6509_s1 + $0x32c] ss:$16 sps:$4 sm:$0xff]  }
  0x43   :  { %1177 = vmatpush1.bf16.msra.mxu0 %v4614_v10  ;;  %1280 = vmatpush1.bf16.msra.mxu1 %v4617_v11  ;;  %v4668_v10 = vld [vmem:[%s6509_s1 + $0x320] ss:$16 sps:$4 sm:$0xff]   ;;  %v4671_v11 = vld [vmem:[%s6509_s1 + $0x328] ss:$16 sps:$4 sm:$0xff]  }
  0x44   :  { %1178 = vmatprep.subr.bf16.mxu0 %v4622_v12  ;;  %1281 = vmatprep.subr.bf16.mxu1 %v4625_v13  ;;  %v5513_v12 = vpack.c.bf16 %v5497_v5, %v5492_v3  ;;  %v4676_v13 = vld [vmem:[%s6509_s1 + $0x344] ss:$16 sps:$4 sm:$0xff]  }
  0x45   :  { %529 = vmatprep.mubr.bf16.mxu0 %v5285_v14  ;;  %632 = vmatprep.mubr.bf16.mxu1 %v5285_v14 }
  0x47   :  { %1179 = vmatpush1.bf16.msra.mxu0 %v4620_v15  ;;  %1282 = vmatpush1.bf16.msra.mxu1 %v4623_v16  ;;  %v5523_v15 = vld [vmem:[%s6510_s0 + $0xa0] sm:$0xff]  ;;  %v5528_v16 = vld [vmem:[%s6510_s0 + $0xb0] sm:$0xff] }
  0x48   :  { %1180 = vmatprep.subr.bf16.mxu0 %v4628_v19  ;;  %1283 = vmatprep.subr.bf16.mxu1 %v4631_v20  ;;  %v4679_v19 = vld [vmem:[%s6509_s1 + $0x34c] ss:$16 sps:$4 sm:$0xff]   ;;  %v4674_v20 = vld [vmem:[%s6509_s1 + $0x340] ss:$16 sps:$4 sm:$0xff]  }
  0x4a   :  { %530 = vmatmul.mubr.bf16.gmra.mrb[4].mxu0 %v5319_v23  ;;  %633 = vmatmul.mubr.bf16.gmra.mrb[4].mxu1 %v5319_v23 }
  0x4b   :  { %1181 = vmatpush1.bf16.msra.mxu0 %v4626_v21  ;;  %1284 = vmatpush1.bf16.msra.mxu1 %v4629_v22  ;;  %v4677_v21 = vld [vmem:[%s6509_s1 + $0x348] ss:$16 sps:$4 sm:$0xff]   ;;  %v5543_v22 = vpack.c.bf16 %v5528_v16, %v5523_v15 }
  0x4c   :  { %1182 = vmatprep.subr.bf16.mxu0 %v4634_v26  ;;  %1285 = vmatprep.subr.bf16.mxu1 %v4637_v27  ;;  %v5548_v26 = vld [vmem:[%s6510_s0 + $0xc8] sm:$0xff]  ;;  %v5553_v27 = vld [vmem:[%s6510_s0 + $0xd8] sm:$0xff] }
  0x4d   :  { %539 = vmatprep.mubr.bf16.mxu0 %v5342_v29  ;;  %642 = vmatprep.mubr.bf16.mxu1 %v5342_v29 }
  0x4f   :  { %1183 = vmatpush1.bf16.msra.mxu0 %v4632_v28  ;;  %1286 = vmatpush1.bf16.msra.mxu1 %v4635_v30  ;;  %v4682_v28 = vld [vmem:[%s6509_s1 + $0x364] ss:$16 sps:$4 sm:$0xff]   ;;  %v4685_v30 = vld [vmem:[%s6509_s1 + $0x36c] ss:$16 sps:$4 sm:$0xff]  }
  0x50   :  { %1184 = vmatprep.subr.bf16.mxu0 %v4640_v33  ;;  %1287 = vmatprep.subr.bf16.mxu1 %v4643_v34  ;;  %v4680_v33 = vld [vmem:[%s6509_s1 + $0x360] ss:$16 sps:$4 sm:$0xff]   ;;  %v4683_v34 = vld [vmem:[%s6509_s1 + $0x368] ss:$16 sps:$4 sm:$0xff]  }
  0x52   :  { %540 = vmatmul.mubr.bf16.gmra.mrb[8].mxu0 %v5372_v36  ;;  %643 = vmatmul.mubr.bf16.gmra.mrb[8].mxu1 %v5372_v36 }
  0x53   :  { %1185 = vmatpush1.bf16.msra.mxu0 %v4638_v35  ;;  %1288 = vmatpush1.bf16.msra.mxu1 %v4641_v39  ;;  %v5569_v35 = vpack.c.bf16 %v5553_v27, %v5548_v26  ;;  %v4688_v39 = vld [vmem:[%s6509_s1 + $0x384] ss:$16 sps:$4 sm:$0xff]  }
  0x54   :  { %1186 = vmatprep.subr.bf16.mxu0 %v4646_v40  ;;  %1289 = vmatprep.subr.bf16.mxu1 %v4649_v41  ;;  %v5579_v40 = vld [vmem:[%s6510_s0 + $0xc0] sm:$0xff]  ;;  %v5584_v41 = vld [vmem:[%s6510_s0 + $0xd0] sm:$0xff] }
  0x55   :  { %549 = vmatprep.mubr.bf16.mxu0 %v5398_v43  ;;  %652 = vmatprep.mubr.bf16.mxu1 %v5398_v43 }
  0x57   :  { %1187 = vmatpush1.bf16.msra.mxu0 %v4644_v42  ;;  %1290 = vmatpush1.bf16.msra.mxu1 %v4647_v44  ;;  %v4691_v42 = vld [vmem:[%s6509_s1 + $0x38c] ss:$16 sps:$4 sm:$0xff]   ;;  %v4686_v44 = vld [vmem:[%s6509_s1 + $0x380] ss:$16 sps:$4 sm:$0xff]  }
  0x58   :  { %1188 = vmatprep.subr.bf16.mxu0 %v4652_v45  ;;  %1291 = vmatprep.subr.bf16.mxu1 %v4655_v49  ;;  %v4689_v45 = vld [vmem:[%s6509_s1 + $0x388] ss:$16 sps:$4 sm:$0xff]   ;;  %v5599_v49 = vpack.c.bf16 %v5584_v41, %v5579_v40 }
  0x5a   :  { %550 = vmatmul.mubr.bf16.gmra.mrb[12].mxu0 %v5425_v50  ;;  %653 = vmatmul.mubr.bf16.gmra.mrb[12].mxu1 %v5425_v50 }
  0x5b   :  { %1189 = vmatpush1.bf16.msra.mxu0 %v4650_v53  ;;  %1292 = vmatpush1.bf16.msra.mxu1 %v4653_v54  ;;  %v4694_v53 = vld [vmem:[%s6509_s1 + $0x3a4] ss:$16 sps:$4 sm:$0xff]   ;;  %v4697_v54 = vld [vmem:[%s6509_s1 + $0x3ac] ss:$16 sps:$4 sm:$0xff]  }
  0x5c   :  { %1190 = vmatprep.subr.bf16.mxu0 %v4658_v55  ;;  %1293 = vmatprep.subr.bf16.mxu1 %v4661_v56  ;;  %v778_v55 = vpack.c.bf16 %v5263_v7, %v5189_v47  ;;  %v4692_v56 = vld [vmem:[%s6509_s1 + $0x3a0] ss:$16 sps:$4 sm:$0xff]   ;;  %v4703_v47 = vld [vmem:[%s6509_s1 + $0x3cc] ss:$16 sps:$4 sm:$0xff]  }
  0x5d   :  { %559 = vmatprep.mubr.bf16.mxu0 %v5454_v58  ;;  %662 = vmatprep.mubr.bf16.mxu1 %v5454_v58  ;;  %v4698_v7 = vld [vmem:[%s6509_s1 + $0x3c0] ss:$16 sps:$4 sm:$0xff]  }
  0x5f   :  { %1191 = vmatpush1.bf16.msra.mxu0 %v4656_v57  ;;  %1294 = vmatpush1.bf16.msra.mxu1 %v4659_v59  ;;  %v4695_v57 = vld [vmem:[%s6509_s1 + $0x3a8] ss:$16 sps:$4 sm:$0xff]   ;;  %v4700_v59 = vld [vmem:[%s6509_s1 + $0x3c4] ss:$16 sps:$4 sm:$0xff]  }
  0x60   :  { %1192 = vmatprep.subr.bf16.mxu0 %v4664_v60  ;;  %1295 = vmatprep.subr.bf16.mxu1 %v4667_v63  ;;  %v4701_v60 = vld [vmem:[%s6509_s1 + $0x3c8] ss:$16 sps:$4 sm:$0xff]   ;;  %v4706_v63 = vld [vmem:[%s6509_s1 + $0x3e4] ss:$16 sps:$4 sm:$0xff]  }
  0x62   :  { %560 = vmatmul.mubr.bf16.gmra.mrb[16].mxu0 %v5487_v2  ;;  %663 = vmatmul.mubr.bf16.gmra.mrb[16].mxu1 %v5487_v2 }
  0x63   :  { %1193 = vmatpush1.bf16.msra.mxu0 %v4662_v0  ;;  %1296 = vmatpush1.bf16.msra.mxu1 %v4665_v1  ;;  %v4709_v0 = vld [vmem:[%s6509_s1 + $0x3ec] ss:$16 sps:$4 sm:$0xff]   ;;  %v4704_v1 = vld [vmem:[%s6509_s1 + $0x3e0] ss:$16 sps:$4 sm:$0xff]  }
  0x64   :  { %1194 = vmatprep.subr.bf16.mxu0 %v4670_v6  ;;  %1297 = vmatprep.subr.bf16.mxu1 %v4673_v8  ;;  %v4707_v6 = vld [vmem:[%s6509_s1 + $0x3e8] ss:$16 sps:$4 sm:$0xff]   ;;  %v4712_v8 = vld [vmem:[%s6509_s1 + $0x404] ss:$16 sps:$4 sm:$0xff]  }
  0x65   :  { %569 = vmatprep.mubr.bf16.mxu0 %v5513_v12  ;;  %672 = vmatprep.mubr.bf16.mxu1 %v5513_v12 }
  0x67   :  { %1195 = vmatpush1.bf16.msra.mxu0 %v4668_v10  ;;  %1298 = vmatpush1.bf16.msra.mxu1 %v4671_v11  ;;  %v4715_v10 = vld [vmem:[%s6509_s1 + $0x40c] ss:$16 sps:$4 sm:$0xff]   ;;  %v4710_v11 = vld [vmem:[%s6509_s1 + $0x400] ss:$16 sps:$4 sm:$0xff]  }
  0x68   :  { %1196 = vmatprep.subr.bf16.mxu0 %v4676_v13  ;;  %1299 = vmatprep.subr.bf16.mxu1 %v4679_v19  ;;  %v4713_v13 = vld [vmem:[%s6509_s1 + $0x408] ss:$16 sps:$4 sm:$0xff]   ;;  %v777_v19 = vpack.c.bf16 %v5296_v17, %v5252_v4  ;;  %v4716_v4 = vld [vmem:[%s6509_s1 + $0x420] ss:$16 sps:$4 sm:$0xff]  }
  0x69   :  { %v4719_v17 = vld [vmem:[%s6509_s1 + $0x428] ss:$16 sps:$4 sm:$0xff]  }
  0x6a   :  { %570 = vmatmul.mubr.bf16.gmra.mrb[20].mxu0 %v5543_v22  ;;  %673 = vmatmul.mubr.bf16.gmra.mrb[20].mxu1 %v5543_v22 }
  0x6b   :  { %1197 = vmatpush1.bf16.msra.mxu0 %v4674_v20  ;;  %1300 = vmatpush1.bf16.msra.mxu1 %v4677_v21  ;;  %v4718_v20 = vld [vmem:[%s6509_s1 + $0x424] ss:$16 sps:$4 sm:$0xff]   ;;  %v4721_v21 = vld [vmem:[%s6509_s1 + $0x42c] ss:$16 sps:$4 sm:$0xff]  }
  0x6c   :  { %1198 = vmatprep.subr.bf16.mxu0 %v4682_v28  ;;  %1301 = vmatprep.subr.bf16.mxu1 %v4685_v30  ;;  %v780_v28 = vpack.c.bf16 %v5324_v24, %v5269_v9  ;;  %v4724_v30 = vld [vmem:[%s6509_s1 + $0x444] ss:$16 sps:$4 sm:$0xff]   ;;  %v4727_v9 = vld [vmem:[%s6509_s1 + $0x44c] ss:$16 sps:$4 sm:$0xff]   ;;  %v779_v24 = vpack.c.bf16 %v5352_v31, %v5301_v18  ;;  %v782_v31 = vpack.c.bf16 %v5377_v37, %v5329_v25  ;;  %v4734_v37 = vld [vmem:[%s6509_s1 + $0x480] ss:$16 sps:$4 sm:$0xff]  }
  0x6d   :  { %579 = vmatprep.mubr.bf16.mxu0 %v5569_v35  ;;  %682 = vmatprep.mubr.bf16.mxu1 %v5569_v35  ;;  %v4733_v18 = vld [vmem:[%s6509_s1 + $0x46c] ss:$16 sps:$4 sm:$0xff]  }
  0x6e   :  { %v4739_v25 = vld [vmem:[%s6509_s1 + $0x48c] ss:$16 sps:$4 sm:$0xff]  }
  0x6f   :  { %1199 = vmatpush1.bf16.msra.mxu0 %v4680_v33  ;;  %1302 = vmatpush1.bf16.msra.mxu1 %v4683_v34  ;;  %v4722_v33 = vld [vmem:[%s6509_s1 + $0x440] ss:$16 sps:$4 sm:$0xff]   ;;  %v4725_v34 = vld [vmem:[%s6509_s1 + $0x448] ss:$16 sps:$4 sm:$0xff]  }
  0x70   :  { %1200 = vmatprep.subr.bf16.mxu0 %v4688_v39  ;;  %1303 = vmatprep.subr.bf16.mxu1 %v4691_v42  ;;  %v4730_v39 = vld [vmem:[%s6509_s1 + $0x464] ss:$16 sps:$4 sm:$0xff]   ;;  %v4728_v42 = vld [vmem:[%s6509_s1 + $0x460] ss:$16 sps:$4 sm:$0xff]  }
  0x72   :  { %580 = vmatmul.mubr.bf16.gmra.mrb[24].mxu0 %v5599_v49  ;;  %683 = vmatmul.mubr.bf16.gmra.mrb[24].mxu1 %v5599_v49 }
  0x73   :  { %1201 = vmatpush1.bf16.msra.mxu0 %v4686_v44  ;;  %1304 = vmatpush1.bf16.msra.mxu1 %v4689_v45  ;;  %v4731_v44 = vld [vmem:[%s6509_s1 + $0x468] ss:$16 sps:$4 sm:$0xff]   ;;  %v4736_v45 = vld [vmem:[%s6509_s1 + $0x484] ss:$16 sps:$4 sm:$0xff]  }
  0x74   :  { %1202 = vmatprep.subr.bf16.mxu0 %v4694_v53  ;;  %1305 = vmatprep.subr.bf16.mxu1 %v4697_v54  ;;  %v4737_v53 = vld [vmem:[%s6509_s1 + $0x488] ss:$16 sps:$4 sm:$0xff]   ;;  %v781_v54 = vpack.c.bf16 %v5411_v46, %v5357_v32  ;;  %v4748_v46 = vld [vmem:[%s6509_s1 + $0x4c4] ss:$16 sps:$4 sm:$0xff]  }
  0x75   :  { %1208 = vmatprep.mubr.bf16.mxu0 %v778_v55  ;;  %1311 = vmatprep.mubr.bf16.mxu1 %v778_v55  ;;  %v4742_v55 = vld [vmem:[%s6509_s1 + $0x4a4] ss:$16 sps:$4 sm:$0xff]   ;;  %v4743_v32 = vld [vmem:[%s6509_s1 + $0x4a8] ss:$16 sps:$4 sm:$0xff]  }
  0x77   :  { %1203 = vmatpush1.bf16.msra.mxu0 %v4692_v56  ;;  %1306 = vmatpush1.bf16.msra.mxu1 %v4695_v57  ;;  %v4745_v56 = vld [vmem:[%s6509_s1 + $0x4ac] ss:$16 sps:$4 sm:$0xff]   ;;  %v784_v57 = vpack.c.bf16 %v5430_v51, %v5382_v38  ;;  %v4746_v51 = vld [vmem:[%s6509_s1 + $0x4c0] ss:$16 sps:$4 sm:$0xff]  }
  0x78   :  { %1204 = vmatprep.subr.bf16.mxu0 %v4700_v59  ;;  %1307 = vmatprep.subr.bf16.mxu1 %v4703_v47  ;;  %v4740_v59 = vld [vmem:[%s6509_s1 + $0x4a0] ss:$16 sps:$4 sm:$0xff]   ;;  %v4751_v38 = vld [vmem:[%s6509_s1 + $0x4cc] ss:$16 sps:$4 sm:$0xff]   ;;  %v783_v47 = vpack.c.bf16 %v5467_v61, %v5416_v48  ;;  %v4755_v61 = vld [vmem:[%s6509_s1 + $0x4e8] ss:$16 sps:$4 sm:$0xff]  }
  0x79   :  { %v4752_v48 = vld [vmem:[%s6509_s1 + $0x4e0] ss:$16 sps:$4 sm:$0xff]  }
  0x7b   :  { %1205 = vmatpush1.bf16.msra.mxu0 %v4698_v7  ;;  %1308 = vmatpush1.bf16.msra.mxu1 %v4701_v60  ;;  %v4749_v7 = vld [vmem:[%s6509_s1 + $0x4c8] ss:$16 sps:$4 sm:$0xff]   ;;  %v4754_v60 = vld [vmem:[%s6509_s1 + $0x4e4] ss:$16 sps:$4 sm:$0xff]  }
  0x7c   :  { %1206 = vmatprep.subr.bf16.mxu0 %v4706_v63  ;;  %1309 = vmatprep.subr.bf16.mxu1 %v4709_v0  ;;  %v4757_v63 = vld [vmem:[%s6509_s1 + $0x4ec] ss:$16 sps:$4 sm:$0xff]   ;;  %v786_v0 = vpack.c.bf16 %v5492_v3, %v5435_v52  ;;  %v4761_v52 = vld [vmem:[%s6509_s1 + $0x508] ss:$16 sps:$4 sm:$0xff]   ;;  %v4766_v3 = vld [vmem:[%s6509_s1 + $0x524] ss:$16 sps:$4 sm:$0xff]  }
  0x7f   :  { %1207 = vmatpush1.bf16.msra.mxu0 %v4704_v1  ;;  %1310 = vmatpush1.bf16.msra.mxu1 %v4707_v6  ;;  %v4760_v1 = vld [vmem:[%s6509_s1 + $0x504] ss:$16 sps:$4 sm:$0xff]   ;;  %v4763_v6 = vld [vmem:[%s6509_s1 + $0x50c] ss:$16 sps:$4 sm:$0xff]  }
  0x80   :  { %1865 = vmatprep.subr.bf16.mxu0 %v4712_v8  ;;  %1968 = vmatprep.subr.bf16.mxu1 %v4715_v10  ;;  %v4758_v8 = vld [vmem:[%s6509_s1 + $0x500] ss:$16 sps:$4 sm:$0xff]   ;;  %v4769_v10 = vld [vmem:[%s6509_s1 + $0x52c] ss:$16 sps:$4 sm:$0xff]  }
  0x82   :  { %1209 = vmatmul.mubr.bf16.vlgmr.msra.gmra.mrb[0].mxu0 %v777_v19  ;;  %1312 = vmatmul.mubr.bf16.vlgmr.msra.gmra.mrb[0].mxu1 %v777_v19  ;;  %v4767_v19 = vld [vmem:[%s6509_s1 + $0x528] ss:$16 sps:$4 sm:$0xff]  }
  0x83   :  { %1866 = vmatpush1.bf16.msra.mxu0 %v4710_v11  ;;  %1969 = vmatpush1.bf16.msra.mxu1 %v4713_v13  ;;  %v785_v11 = vpack.c.bf16 %v5523_v15, %v5472_v62  ;;  %v4764_v13 = vld [vmem:[%s6509_s1 + $0x520] ss:$16 sps:$4 sm:$0xff]   ;;  %v4772_v62 = vld [vmem:[%s6509_s1 + $0x544] ss:$16 sps:$4 sm:$0xff]   ;;  %v4775_v15 = vld [vmem:[%s6509_s1 + $0x54c] ss:$16 sps:$4 sm:$0xff]  }
  0x84   :  { %1867 = vmatprep.subr.bf16.mxu0 %v4718_v20  ;;  %1970 = vmatprep.subr.bf16.mxu1 %v4721_v21  ;;  %v788_v20 = vpack.c.bf16 %v5548_v26, %v5497_v5  ;;  %v5790_v21 = vld [vmem:[%s6510_s0 + $0xe8] sm:$0xff]  ;;  %v4770_v5 = vld [vmem:[%s6509_s1 + $0x540] ss:$16 sps:$4 sm:$0xff]  }
  0x85   :  { %1218 = vmatprep.mubr.bf16.mxu0 %v780_v28  ;;  %1321 = vmatprep.mubr.bf16.mxu1 %v780_v28  ;;  %v4773_v26 = vld [vmem:[%s6509_s1 + $0x548] ss:$16 sps:$4 sm:$0xff]   ;;  %v4778_v28 = vld [vmem:[%s6509_s1 + $0x564] ss:$16 sps:$4 sm:$0xff]  }
  0x87   :  { %1868 = vmatpush1.bf16.msra.mxu0 %v4716_v4  ;;  %1971 = vmatpush1.bf16.msra.mxu1 %v4719_v17  ;;  %v4781_v4 = vld [vmem:[%s6509_s1 + $0x56c] ss:$16 sps:$4 sm:$0xff]   ;;  %v787_v17 = vpack.c.bf16 %v5579_v40, %v5528_v16  ;;  %v4784_v16 = vld [vmem:[%s6509_s1 + $0x584] ss:$16 sps:$4 sm:$0xff]  }
  0x88   :  { %1869 = vmatprep.subr.bf16.mxu0 %v4724_v30  ;;  %1972 = vmatprep.subr.bf16.mxu1 %v4727_v9  ;;  %v4776_v30 = vld [vmem:[%s6509_s1 + $0x560] ss:$16 sps:$4 sm:$0xff]   ;;  %v4779_v9 = vld [vmem:[%s6509_s1 + $0x568] ss:$16 sps:$4 sm:$0xff]   ;;  %v4787_v40 = vld [vmem:[%s6509_s1 + $0x58c] ss:$16 sps:$4 sm:$0xff]  }
  0x8a   :  { %1219 = vmatmul.mubr.bf16.gmra.mrb[4].mxu0 %v779_v24  ;;  %1322 = vmatmul.mubr.bf16.gmra.mrb[4].mxu1 %v779_v24  ;;  %v790_v24 = vpack.c.bf16 %v5790_v21, %v5553_v27 }
  0x8b   :  { %1870 = vmatpush1.bf16.msra.mxu0 %v4722_v33  ;;  %1973 = vmatpush1.bf16.msra.mxu1 %v4725_v34  ;;  %v5817_v33 = vld [vmem:[%s6510_s0 + $0xe0] sm:$0xff] }
  0x8c   :  { %1871 = vmatprep.subr.bf16.mxu0 %v4730_v39  ;;  %1974 = vmatprep.subr.bf16.mxu1 %v4733_v18  ;;  %v789_v27 = vpack.c.bf16 %v5817_v33, %v5584_v41  ;;  %v4782_v34 = vld [vmem:[%s6509_s1 + $0x580] ss:$16 sps:$4 sm:$0xff]   ;;  %v4785_v39 = vld [vmem:[%s6509_s1 + $0x588] ss:$16 sps:$4 sm:$0xff]   ;;  %v4790_v18 = vld [vmem:[%s6509_s1 + $0x5a4] ss:$16 sps:$4 sm:$0xff]  }
  0x8d   :  { %1228 = vmatprep.mubr.bf16.mxu0 %v782_v31  ;;  %1331 = vmatprep.mubr.bf16.mxu1 %v782_v31  ;;  %v4793_v41 = vld [vmem:[%s6509_s1 + $0x5ac] ss:$16 sps:$4 sm:$0xff]   ;;  %v4788_v31 = vld [vmem:[%s6509_s1 + $0x5a0] ss:$16 sps:$4 sm:$0xff]  }
  0x8f   :  { %1872 = vmatpush1.bf16.msra.mxu0 %v4728_v42  ;;  %1975 = vmatpush1.bf16.msra.mxu1 %v4731_v44  ;;  %v4791_v42 = vld [vmem:[%s6509_s1 + $0x5a8] ss:$16 sps:$4 sm:$0xff]   ;;  %v4796_v44 = vld [vmem:[%s6509_s1 + $0x5c4] ss:$16 sps:$4 sm:$0xff]  }
  0x90   :  { %1873 = vmatprep.subr.bf16.mxu0 %v4736_v45  ;;  %1976 = vmatprep.subr.bf16.mxu1 %v4739_v25  ;;  %v4799_v45 = vld [vmem:[%s6509_s1 + $0x5cc] ss:$16 sps:$4 sm:$0xff]   ;;  %v4794_v25 = vld [vmem:[%s6509_s1 + $0x5c0] ss:$16 sps:$4 sm:$0xff]  }
  0x92   :  { %1229 = vmatmul.mubr.bf16.gmra.mrb[8].mxu0 %v781_v54  ;;  %1332 = vmatmul.mubr.bf16.gmra.mrb[8].mxu1 %v781_v54  ;;  %v4800_v54 = vld [vmem:[%s6509_s1 + $0x5e0] ss:$16 sps:$4 sm:$0xff]  }
  0x93   :  { %1874 = vmatpush1.bf16.msra.mxu0 %v4734_v37  ;;  %1977 = vmatpush1.bf16.msra.mxu1 %v4737_v53  ;;  %v4797_v37 = vld [vmem:[%s6509_s1 + $0x5c8] ss:$16 sps:$4 sm:$0xff]   ;;  %v4802_v53 = vld [vmem:[%s6509_s1 + $0x5e4] ss:$16 sps:$4 sm:$0xff]  }
  0x94   :  { %1875 = vmatprep.subr.bf16.mxu0 %v4742_v55  ;;  %1978 = vmatprep.subr.bf16.mxu1 %v4745_v56  ;;  %v4803_v55 = vld [vmem:[%s6509_s1 + $0x5e8] ss:$16 sps:$4 sm:$0xff]   ;;  %v4808_v56 = vld [vmem:[%s6511_s3 + $0x4] ss:$8 sps:$4 sm:$0xff]  }
  0x95   :  { %1238 = vmatprep.mubr.bf16.mxu0 %v784_v57  ;;  %1341 = vmatprep.mubr.bf16.mxu1 %v784_v57  ;;  %v4806_v57 = vld [vmem:[%s6511_s3] ss:$8 sps:$4 sm:$0xff]  }
  0x97   :  { %1876 = vmatpush1.bf16.msra.mxu0 %v4740_v59  ;;  %1979 = vmatpush1.bf16.msra.mxu1 %v4743_v32  ;;  %v4811_v59 = vld [vmem:[%s6511_s3 + $0x14] ss:$8 sps:$4 sm:$0xff]   ;;  %v4809_v32 = vld [vmem:[%s6511_s3 + $0x10] ss:$8 sps:$4 sm:$0xff]  }
  0x98   :  { %1877 = vmatprep.subr.bf16.mxu0 %v4748_v46  ;;  %1980 = vmatprep.subr.bf16.mxu1 %v4751_v38  ;;  %v4814_v46 = vld [vmem:[%s6511_s3 + $0x24] ss:$8 sps:$4 sm:$0xff]   ;;  %v4812_v38 = vld [vmem:[%s6511_s3 + $0x20] ss:$8 sps:$4 sm:$0xff]  }
  0x9a   :  { %1239 = vmatmul.mubr.bf16.gmra.mrb[12].mxu0 %v783_v47  ;;  %1342 = vmatmul.mubr.bf16.gmra.mrb[12].mxu1 %v783_v47  ;;  %v4818_v47 = vld [vmem:[%s6511_s3 + $0x40] ss:$8 sps:$4 sm:$0xff]  }
  0x9b   :  { %1878 = vmatpush1.bf16.msra.mxu0 %v4746_v51  ;;  %1981 = vmatpush1.bf16.msra.mxu1 %v4749_v7  ;;  %v4820_v51 = vld [vmem:[%s6511_s3 + $0x44] ss:$8 sps:$4 sm:$0xff]  }
  0x9c   :  { %1879 = vmatprep.subr.bf16.mxu0 %v4754_v60  ;;  %1982 = vmatprep.subr.bf16.mxu1 %v4757_v63  ;;  %v4826_v7 = vld [vmem:[%s6511_s3 + $0x64] ss:$8 sps:$4 sm:$0xff]   ;;  %v4824_v60 = vld [vmem:[%s6511_s3 + $0x60] ss:$8 sps:$4 sm:$0xff]  }
  0x9d   :  { %1248 = vmatprep.mubr.bf16.mxu0 %v786_v0  ;;  %1351 = vmatprep.mubr.bf16.mxu1 %v786_v0  ;;  %v4832_v63 = vld [vmem:[%s6511_s3 + $0x84] ss:$8 sps:$4 sm:$0xff]  }
  0x9e   :  { %v4838_v0 = vld [vmem:[%s6511_s3 + $0xa4] ss:$8 sps:$4 sm:$0xff]  }
  0x9f   :  { %1880 = vmatpush1.bf16.msra.mxu0 %v4752_v48  ;;  %1983 = vmatpush1.bf16.msra.mxu1 %v4755_v61  ;;  %v4830_v48 = vld [vmem:[%s6511_s3 + $0x80] ss:$8 sps:$4 sm:$0xff]   ;;  %v4833_v61 = vld [vmem:[%s6511_s3 + $0x90] ss:$8 sps:$4 sm:$0xff]  }
  0xa0   :  { %1881 = vmatprep.subr.bf16.mxu0 %v4760_v1  ;;  %1984 = vmatprep.subr.bf16.mxu1 %v4763_v6  ;;  %v1464_v1 = vld [vmem:[%s6510_s0 + $0xf0] sm:$0xff] }
  0xa1   :  { %v1478_v6 = vpack.c.bf16 %v1464_v1, %v5817_v33 }
  0xa2   :  { %1249 = vmatmul.mubr.bf16.gmra.mrb[16].mxu0 %v785_v11  ;;  %1352 = vmatmul.mubr.bf16.gmra.mrb[16].mxu1 %v785_v11  ;;  %v4845_v11 = vld [vmem:[%s6511_s3 + $0xd0] ss:$8 sps:$4 sm:$0xff]  }
  0xa3   :  { %1882 = vmatpush1.bf16.msra.mxu0 %v4758_v8  ;;  %1985 = vmatpush1.bf16.msra.mxu1 %v4761_v52  ;;  %v4841_v8 = vld [vmem:[%s6511_s3 + $0xb4] ss:$8 sps:$4 sm:$0xff]   ;;  %v4839_v52 = vld [vmem:[%s6511_s3 + $0xb0] ss:$8 sps:$4 sm:$0xff]  }
  0xa4   :  { %1883 = vmatprep.subr.bf16.mxu0 %v4766_v3  ;;  %1986 = vmatprep.subr.bf16.mxu1 %v4769_v10  ;;  %v4842_v3 = vld [vmem:[%s6511_s3 + $0xc0] ss:$8 sps:$4 sm:$0xff]   ;;  %v4847_v10 = vld [vmem:[%s6511_s3 + $0xd4] ss:$8 sps:$4 sm:$0xff]  }
  0xa5   :  { %1258 = vmatprep.mubr.bf16.mxu0 %v788_v20  ;;  %1361 = vmatprep.mubr.bf16.mxu1 %v788_v20  ;;  %v4853_v20 = vld [vmem:[%s6511_s3 + $0xf4] ss:$8 sps:$4 sm:$0xff]  }
  0xa7   :  { %1884 = vmatpush1.bf16.msra.mxu0 %v4764_v13  ;;  %1987 = vmatpush1.bf16.msra.mxu1 %v4767_v19  ;;  %v4850_v13 = vld [vmem:[%s6511_s3 + $0xe4] ss:$8 sps:$4 sm:$0xff]   ;;  %v4848_v19 = vld [vmem:[%s6511_s3 + $0xe0] ss:$8 sps:$4 sm:$0xff]  }
  0xa8   :  { %1885 = vmatprep.subr.bf16.mxu0 %v4772_v62  ;;  %1988 = vmatprep.subr.bf16.mxu1 %v4775_v15  ;;  %v4851_v62 = vld [vmem:[%s6511_s3 + $0xf0] ss:$8 sps:$4 sm:$0xff]   ;;  %v4856_v15 = vld [vmem:[%s6511_s3 + $0x104] ss:$8 sps:$4 sm:$0xff]  }
  0xaa   :  { %1259 = vmatmul.mubr.bf16.gmra.mrb[20].mxu0 %v787_v17  ;;  %1362 = vmatmul.mubr.bf16.gmra.mrb[20].mxu1 %v787_v17 }
  0xab   :  { %1886 = vmatpush1.bf16.msra.mxu0 %v4770_v5  ;;  %1989 = vmatpush1.bf16.msra.mxu1 %v4773_v26 }
  0xac   :  { %1887 = vmatprep.subr.bf16.mxu0 %v4778_v28  ;;  %1990 = vmatprep.subr.bf16.mxu1 %v4781_v4  ;;  %v39_v4 = vld [vmem:[%s6512_s2] sm:$0xf] }
  0xad   :  { %1268 = vmatprep.mubr.bf16.mxu0 %v790_v24  ;;  %1371 = vmatprep.mubr.bf16.mxu1 %v790_v24 }
  0xaf   :  { %1888 = vmatpush1.bf16.msra.mxu0 %v4776_v30  ;;  %1991 = vmatpush1.bf16.msra.mxu1 %v4779_v9 }
  0xb0   :  { %1889 = vmatprep.subr.bf16.mxu0 %v4784_v16  ;;  %1992 = vmatprep.subr.bf16.mxu1 %v4787_v40 }
  0xb2   :  { %1269 = vmatmul.mubr.bf16.gmra.mrb[24].mxu0 %v789_v27  ;;  %1372 = vmatmul.mubr.bf16.gmra.mrb[24].mxu1 %v789_v27 }
  0xb3   :  { %1890 = vmatpush1.bf16.msra.mxu0 %v4782_v34  ;;  %1993 = vmatpush1.bf16.msra.mxu1 %v4785_v39 }
  0xb4   :  { %1891 = vmatprep.subr.bf16.mxu0 %v4790_v18  ;;  %1994 = vmatprep.subr.bf16.mxu1 %v4793_v41 }
  0xb5   :  { %1897 = vmatprep.mubr.bf16.mxu0 %v5285_v14  ;;  %2000 = vmatprep.mubr.bf16.mxu1 %v5285_v14  ;;  %v4805_v14 = vld [vmem:[%s6509_s1 + $0x5ec] ss:$16 sps:$4 sm:$0xff]  }
  0xb7   :  { %1892 = vmatpush1.bf16.msra.mxu0 %v4788_v31  ;;  %1995 = vmatpush1.bf16.msra.mxu1 %v4791_v42 }
  0xb8   :  { %1893 = vmatprep.subr.bf16.mxu0 %v4796_v44  ;;  %1996 = vmatprep.subr.bf16.mxu1 %v4799_v45 }
  0xbb   :  { %1894 = vmatpush1.bf16.msra.mxu0 %v4794_v25  ;;  %1997 = vmatpush1.bf16.msra.mxu1 %v4797_v37 }
  0xbc   :  { %1895 = vmatprep.subr.bf16.mxu0 %v4802_v53  ;;  %1998 = vmatprep.subr.bf16.mxu1 %v4805_v14 }
  0xbf   :  { %1896 = vmatpush1.bf16.msra.mxu0 %v4800_v54  ;;  %1999 = vmatpush1.bf16.msra.mxu1 %v4803_v55 }
  0xc0   :  { %2730 = vmatprep.subr.bf16.mxu0 %v4808_v56 }
  0xc2   :  { %1898 = vmatmul.mubr.bf16.vlgmr.msra.gmra.mrb[0].mxu0 %v5319_v23  ;;  %2001 = vmatmul.mubr.bf16.vlgmr.msra.gmra.mrb[0].mxu1 %v5319_v23  ;;  %v4817_v23 = vld [vmem:[%s6511_s3 + $0x34] ss:$8 sps:$4 sm:$0xff]  }
  0xc3   :  { %1907 = vmatprep.mubr.bf16.mxu0 %v5342_v29  ;;  %2010 = vmatprep.mubr.bf16.mxu1 %v5342_v29  ;;  %v4815_v29 = vld [vmem:[%s6511_s3 + $0x30] ss:$8 sps:$4 sm:$0xff]  }
  0xc4   :  { %2731 = vmatpush1.bf16.msra.mxu0 %v4806_v57 }
  0xc5   :  { %2732 = vmatprep.subr.bf16.mxu0 %v4811_v59 }
  0xc8   :  { %2733 = vmatpush1.bf16.msra.mxu0 %v4809_v32 }
  0xc9   :  { %2734 = vmatprep.subr.bf16.mxu0 %v4814_v46 }
  0xca   :  { %1908 = vmatmul.mubr.bf16.gmra.mrb[4].mxu0 %v5372_v36  ;;  %2011 = vmatmul.mubr.bf16.gmra.mrb[4].mxu1 %v5372_v36  ;;  %v4823_v36 = vld [vmem:[%s6511_s3 + $0x54] ss:$8 sps:$4 sm:$0xff]  }
  0xcb   :  { %1917 = vmatprep.mubr.bf16.mxu0 %v5398_v43  ;;  %2020 = vmatprep.mubr.bf16.mxu1 %v5398_v43  ;;  %v4821_v43 = vld [vmem:[%s6511_s3 + $0x50] ss:$8 sps:$4 sm:$0xff]  }
  0xcc   :  { %2735 = vmatpush1.bf16.msra.mxu0 %v4812_v38 }
  0xcd   :  { %2736 = vmatprep.subr.bf16.mxu0 %v4817_v23 }
  0xd0   :  { %2737 = vmatpush1.bf16.msra.mxu0 %v4815_v29 }
  0xd1   :  { %2738 = vmatprep.subr.bf16.mxu0 %v4820_v51 }
  0xd2   :  { %1918 = vmatmul.mubr.bf16.gmra.mrb[8].mxu0 %v5425_v50  ;;  %2021 = vmatmul.mubr.bf16.gmra.mrb[8].mxu1 %v5425_v50  ;;  %v4829_v50 = vld [vmem:[%s6511_s3 + $0x74] ss:$8 sps:$4 sm:$0xff]  }
  0xd3   :  { %1927 = vmatprep.mubr.bf16.mxu0 %v5454_v58  ;;  %2030 = vmatprep.mubr.bf16.mxu1 %v5454_v58  ;;  %v4827_v58 = vld [vmem:[%s6511_s3 + $0x70] ss:$8 sps:$4 sm:$0xff]  }
  0xd4   :  { %2739 = vmatpush1.bf16.msra.mxu0 %v4818_v47 }
  0xd5   :  { %2740 = vmatprep.subr.bf16.mxu0 %v4823_v36 }
  0xd8   :  { %2741 = vmatpush1.bf16.msra.mxu0 %v4821_v43 }
  0xd9   :  { %2742 = vmatprep.subr.bf16.mxu0 %v4826_v7 }
  0xda   :  { %1928 = vmatmul.mubr.bf16.gmra.mrb[12].mxu0 %v5487_v2  ;;  %2031 = vmatmul.mubr.bf16.gmra.mrb[12].mxu1 %v5487_v2  ;;  %v4835_v2 = vld [vmem:[%s6511_s3 + $0x94] ss:$8 sps:$4 sm:$0xff]  }
  0xdb   :  { %1937 = vmatprep.mubr.bf16.mxu0 %v5513_v12  ;;  %2040 = vmatprep.mubr.bf16.mxu1 %v5513_v12  ;;  %v1465_v12 = vld [vmem:[%s6510_s0 + $0xf8] sm:$0xff] }
  0xdc   :  { %2743 = vmatpush1.bf16.msra.mxu0 %v4824_v60 }
  0xdd   :  { %2744 = vmatprep.subr.bf16.mxu0 %v4829_v50 }
  0xe0   :  { %2745 = vmatpush1.bf16.msra.mxu0 %v4827_v58 }
  0xe1   :  { %2746 = vmatprep.subr.bf16.mxu0 %v4832_v63 }
  0xe2   :  { %1938 = vmatmul.mubr.bf16.gmra.mrb[16].mxu0 %v5543_v22  ;;  %2041 = vmatmul.mubr.bf16.gmra.mrb[16].mxu1 %v5543_v22  ;;  %v1479_v22 = vpack.c.bf16 %v1465_v12, %v5790_v21  ;;  %v41_v21 = vlaneseq }
  0xe3   :  { %1947 = vmatprep.mubr.bf16.mxu0 %v5569_v35  ;;  %2050 = vmatprep.mubr.bf16.mxu1 %v5569_v35  ;;  %v4836_v35 = vld [vmem:[%s6511_s3 + $0xa0] ss:$8 sps:$4 sm:$0xff]  }
  0xe4   :  { %2747 = vmatpush1.bf16.msra.mxu0 %v4830_v48  ;;  %v6000_v5 = vshrl.u32 %v41_v21, 7 }
  0xe5   :  { %2748 = vmatprep.subr.bf16.mxu0 %v4835_v2 }
  0xe6   :  { %v43_v26 = vsub.s32 0, %v6000_v5  ;;  %v51_v28 = vsub.s32 2, %v6000_v5  ;;  %v47_v17 = vsub.s32 1, %v6000_v5  ;;  %v55_v30 = vsub.s32 3, %v6000_v5 }
  0xe8   :  { %2749 = vmatpush1.bf16.msra.mxu0 %v4833_v61  ;;  %v6011_v9 = vrot.slane %v39_v4, %v43_v26  ;;  %v6013_v24 = vrot.slane %v39_v4, %v51_v28  ;;  %v6017_v33 = vrot.slane %v39_v4, %v47_v17  ;;  %v6019_v16 = vrot.slane %v39_v4, %v55_v30 }
  0xe9   :  { %2750 = vmatprep.subr.bf16.mxu0 %v4838_v0 }
  0xea   :  { %1948 = vmatmul.mubr.bf16.gmra.mrb[20].mxu0 %v5599_v49  ;;  %2051 = vmatmul.mubr.bf16.gmra.mrb[20].mxu1 %v5599_v49  ;;  %v4844_v49 = vld [vmem:[%s6511_s3 + $0xc4] ss:$8 sps:$4 sm:$0xff]  }
  0xeb   :  { %1957 = vmatprep.mubr.bf16.mxu0 %v1479_v22  ;;  %2060 = vmatprep.mubr.bf16.mxu1 %v1479_v22 }
  0xec   :  { %2751 = vmatpush1.bf16.msra.mxu0 %v4836_v35 }
  0xed   :  { %2752 = vmatprep.subr.bf16.mxu0 %v4841_v8 }
  0xf0   :  { %2753 = vmatpush1.bf16.msra.mxu0 %v4839_v52 }
  0xf1   :  { %2754 = vmatprep.subr.bf16.mxu0 %v4844_v49 }
  0xf2   :  { %1958 = vmatmul.mubr.bf16.gmra.mrb[24].mxu0 %v1478_v6  ;;  %2061 = vmatmul.mubr.bf16.gmra.mrb[24].mxu1 %v1478_v6 }
  0xf4   :  { %2755 = vmatpush1.bf16.msra.mxu0 %v4842_v3 }
  0xf5   :  { %2756 = vmatprep.subr.bf16.mxu0 %v4847_v10 }
  0xf8   :  { %2757 = vmatpush1.bf16.msra.mxu0 %v4845_v11 }
  0xf9   :  { %2758 = vmatprep.subr.bf16.mxu0 %v4850_v13 }
  0xfc   :  { %2759 = vmatpush1.bf16.msra.mxu0 %v4848_v19 }
  0xfd   :  { %2760 = vmatprep.subr.bf16.mxu0 %v4853_v20 }
 0x100   :  { %2761 = vmatpush1.bf16.msra.mxu0 %v4851_v62 }
 0x101   :  { %2813 = vmatprep.subr.bf16.mxu0 %v4856_v15 }
 0x195   :  { %v1899_v40 = vpop.f32.mrb[0].mxu0  ;;  %v2002_v27 = vpop.f32.mrb[0].mxu1 }
 0x196   :  { %v4287_v34 = vadd.f32 %v1899_v40, %v6011_v9  ;;  %v4315_v39 = vadd.f32 %v2002_v27, %v6013_v24  ;;  %v1901_v18 = vpop.f32.mrb[1].mxu0  ;;  %v2004_v41 = vpop.f32.mrb[1].mxu1 }
 0x197   :  { %v4288_v31 = vadd.f32 %v1901_v18, %v6017_v33  ;;  %v4316_v42 = vadd.f32 %v2004_v41, %v6019_v16  ;;  %v1903_v44 = vpop.f32.mrb[2].mxu0  ;;  %v2006_v45 = vpop.f32.mrb[2].mxu1 }
 0x198   :  { %v2127_v25 = vmax.f32 %v4287_v34, 0.0  ;;  %v2129_v37 = vmax.f32 %v4315_v39, 0.0  ;;  %v4289_v53 = vadd.f32 %v1903_v44, %v6011_v9  ;;  %v4317_v14 = vadd.f32 %v2006_v45, %v6013_v24  ;;  %v1905_v54 = vpop.f32.mrb[3].mxu0  ;;  %v2008_v55 = vpop.f32.mrb[3].mxu1 }
 0x199   :  { %v2128_v56 = vmax.f32 %v4288_v31, 0.0  ;;  %v2130_v57 = vmax.f32 %v4316_v42, 0.0  ;;  %v4290_v59 = vadd.f32 %v1905_v54, %v6017_v33  ;;  %v4318_v32 = vadd.f32 %v2008_v55, %v6019_v16  ;;  %v4854_v54 = vld [vmem:[%s6511_s3 + $0x100] ss:$8 sps:$4 sm:$0xff]  }
 0x19a   :  { %v2131_v46 = vmax.f32 %v4289_v53, 0.0  ;;  %v2133_v38 = vmax.f32 %v4317_v14, 0.0 }
 0x19b   :  { %v2183_v23 = vmax.f32 %v2127_v25, %v2128_v56  ;;  %v2197_v29 = vmax.f32 %v2129_v37, %v2130_v57  ;;  %v2132_v51 = vmax.f32 %v4290_v59, 0.0  ;;  %v2134_v47 = vmax.f32 %v4318_v32, 0.0 }
 0x19d   :  { %v2211_v36 = vmax.f32 %v2183_v23, %v2197_v29  ;;  %v2184_v43 = vmax.f32 %v2131_v46, %v2132_v51  ;;  %v2198_v7 = vmax.f32 %v2133_v38, %v2134_v47  ;;  %v1909_v60 = vpop.f32.mrb[4].mxu0  ;;  %v2012_v50 = vpop.f32.mrb[4].mxu1  ;;  %v4859_v38 = vld [vmem:[%s6511_s3 + $0x114] ss:$8 sps:$4 sm:$0xff]  }
 0x19e   :  { %v4291_v58 = vadd.f32 %v1909_v60, %v6011_v9  ;;  %v4319_v63 = vadd.f32 %v2012_v50, %v6013_v24  ;;  %v1911_v48 = vpop.f32.mrb[5].mxu0  ;;  %v2014_v2 = vpop.f32.mrb[5].mxu1 }
 0x19f   :  { %v2212_v12 = vmax.f32 %v2184_v43, %v2198_v7  ;;  %v4292_v61 = vadd.f32 %v1911_v48, %v6017_v33  ;;  %v4320_v0 = vadd.f32 %v2014_v2, %v6019_v16  ;;  %v1913_v22 = vpop.f32.mrb[6].mxu0  ;;  %v2016_v35 = vpop.f32.mrb[6].mxu1  ;;  %v4857_v48 = vld [vmem:[%s6511_s3 + $0x110] ss:$8 sps:$4 sm:$0xff]  }
 0x1a0   :  { %v2135_v1 = vmax.f32 %v4291_v58, 0.0  ;;  %v2137_v6 = vmax.f32 %v4319_v63, 0.0  ;;  %v4293_v8 = vadd.f32 %v1913_v22, %v6011_v9  ;;  %v4321_v52 = vadd.f32 %v2016_v35, %v6013_v24  ;;  %v1915_v49 = vpop.f32.mrb[7].mxu0  ;;  %v2018_v3 = vpop.f32.mrb[7].mxu1 }
 0x1a1   :  { %v2225_v10 = vpack.c.bf16 %v2212_v12, %v2211_v36  ;;  %v2136_v11 = vmax.f32 %v4292_v61, 0.0  ;;  %v2138_v13 = vmax.f32 %v4320_v0, 0.0  ;;  %v4294_v19 = vadd.f32 %v1915_v49, %v6017_v33 }
 0x1a2   :  { %v2139_v20 = vmax.f32 %v4293_v8, 0.0  ;;  %v2141_v62 = vmax.f32 %v4321_v52, 0.0  ;;  %v4322_v15 = vadd.f32 %v2018_v3, %v6019_v16 }
 0x1a3   :  { %v2185_v21 = vmax.f32 %v2135_v1, %v2136_v11  ;;  %v2199_v28 = vmax.f32 %v2137_v6, %v2138_v13  ;;  %v2140_v4 = vmax.f32 %v4294_v19, 0.0 }
 0x1a4   :  { %v2142_v30 = vmax.f32 %v4322_v15, 0.0 }
 0x1a5   :  { %v2213_v40 = vmax.f32 %v2185_v21, %v2199_v28  ;;  %v2186_v27 = vmax.f32 %v2139_v20, %v2140_v4  ;;  %v1919_v34 = vpop.f32.mrb[8].mxu0  ;;  %v2022_v39 = vpop.f32.mrb[8].mxu1  ;;  %v4860_v20 = vld [vmem:[%s6511_s3 + $0x120] ss:$8 sps:$4 sm:$0xff]  }
 0x1a6   :  { %v2200_v18 = vmax.f32 %v2141_v62, %v2142_v30  ;;  %v4295_v41 = vadd.f32 %v1919_v34, %v6011_v9  ;;  %v4323_v31 = vadd.f32 %v2022_v39, %v6013_v24  ;;  %v1921_v42 = vpop.f32.mrb[9].mxu0  ;;  %v2024_v44 = vpop.f32.mrb[9].mxu1 }
 0x1a7   :  { %v4296_v45 = vadd.f32 %v1921_v42, %v6017_v33  ;;  %v4324_v25 = vadd.f32 %v2024_v44, %v6019_v16  ;;  %v1923_v37 = vpop.f32.mrb[10].mxu0  ;;  %v2026_v53 = vpop.f32.mrb[10].mxu1  ;;  %v2226_v14 = vpack.c.bf16 %v2213_v40, %v2212_v12  ;;  %v4862_v12 = vld [vmem:[%s6511_s3 + $0x124] ss:$8 sps:$4 sm:$0xff]   ;;  %v4863_v42 = vld [vmem:[%s6511_s3 + $0x130] ss:$8 sps:$4 sm:$0xff]  }
 0x1a8   :  { %v2214_v55 = vmax.f32 %v2186_v27, %v2200_v18  ;;  %v2143_v56 = vmax.f32 %v4295_v41, 0.0  ;;  %v2145_v57 = vmax.f32 %v4323_v31, 0.0  ;;  %v4297_v59 = vadd.f32 %v1923_v37, %v6011_v9  ;;  %v1925_v32 = vpop.f32.mrb[11].mxu0  ;;  %v2028_v46 = vpop.f32.mrb[11].mxu1  ;;  %v4868_v44 = vld [vmem:[%s6511_s3 + $0x144] ss:$8 sps:$4 sm:$0xff]  }
 0x1a9   :  { %v2144_v23 = vmax.f32 %v4296_v45, 0.0  ;;  %v2146_v29 = vmax.f32 %v4324_v25, 0.0  ;;  %v4325_v51 = vadd.f32 %v2026_v53, %v6013_v24  ;;  %v4298_v47 = vadd.f32 %v1925_v32, %v6017_v33  ;;  %2762 = vmatprep.mubr.bf16.mxu0 %v2226_v14 }
 0x1aa   :  { %v2147_v36 = vmax.f32 %v4297_v59, 0.0  ;;  %v4326_v43 = vadd.f32 %v2028_v46, %v6019_v16  ;;  %2763 = vmatmul.mubr.bf16.vlgmr.msra.gmra.mrb[28].mxu0 %v2225_v10  ;;  %v6051_v7 = vpack.c.bf16 %v2214_v55, %v2213_v40  ;;  %v4865_v40 = vld [vmem:[%s6511_s3 + $0x134] ss:$8 sps:$4 sm:$0xff]   ;;  %v4866_v46 = vld [vmem:[%s6511_s3 + $0x140] ss:$8 sps:$4 sm:$0xff]  }
 0x1ab   :  { %v2187_v60 = vmax.f32 %v2143_v56, %v2144_v23  ;;  %v2201_v50 = vmax.f32 %v2145_v57, %v2146_v29  ;;  %v2149_v58 = vmax.f32 %v4325_v51, 0.0  ;;  %v2148_v63 = vmax.f32 %v4298_v47, 0.0  ;;  %2814 = vmatpush1.bf16.msra.mxu0 %v4854_v54  ;;  %v4928_v23 = vld [vmem:[%s6513_s5 + $0x48] sm:$0xff]  }
 0x1ac   :  { %v2150_v2 = vmax.f32 %v4326_v43, 0.0  ;;  %2815 = vmatprep.subr.bf16.mxu0 %v4859_v38  ;;  %v4927_v38 = vld [vmem:[%s6513_s5] sm:$0xff]  }
 0x1ad   :  { %v2215_v61 = vmax.f32 %v2187_v60, %v2201_v50  ;;  %v2188_v0 = vmax.f32 %v2147_v36, %v2148_v63  ;;  %v1929_v22 = vpop.f32.mrb[12].mxu0  ;;  %v2032_v35 = vpop.f32.mrb[12].mxu1  ;;  %v4871_v60 = vld [vmem:[%s6511_s3 + $0x154] ss:$8 sps:$4 sm:$0xff]  }
 0x1ae   :  { %v2202_v1 = vmax.f32 %v2149_v58, %v2150_v2  ;;  %v4299_v6 = vadd.f32 %v1929_v22, %v6011_v9  ;;  %v4327_v8 = vadd.f32 %v2032_v35, %v6013_v24  ;;  %v1931_v52 = vpop.f32.mrb[13].mxu0  ;;  %v2034_v49 = vpop.f32.mrb[13].mxu1 }
 0x1af   :  { %v4300_v3 = vadd.f32 %v1931_v52, %v6017_v33  ;;  %v4328_v10 = vadd.f32 %v2034_v49, %v6019_v16  ;;  %2816 = vmatpush1.bf16.msra.mxu0 %v4857_v48  ;;  %v1933_v11 = vpop.f32.mrb[14].mxu0  ;;  %v2036_v13 = vpop.f32.mrb[14].mxu1  ;;  %v6063_v19 = vpack.c.bf16 %v2215_v61, %v2214_v55  ;;  %v4926_v55 = vld [vmem:[%s6513_s5 + $0x40] sm:$0xff]  }
 0x1b0   :  { %v2216_v62 = vmax.f32 %v2188_v0, %v2202_v1  ;;  %v2151_v15 = vmax.f32 %v4299_v6, 0.0  ;;  %v2153_v21 = vmax.f32 %v4327_v8, 0.0  ;;  %v4301_v28 = vadd.f32 %v1933_v11, %v6011_v9  ;;  %v1935_v4 = vpop.f32.mrb[15].mxu0  ;;  %v2038_v30 = vpop.f32.mrb[15].mxu1  ;;  %2817 = vmatprep.subr.bf16.mxu0 %v4862_v12  ;;  %4156 = vmatprep.subr.bf16.mxu1 %v4926_v55  ;;  %v4929_v12 = vld [vmem:[%s6513_s5 + $0x8] sm:$0xff]  }
 0x1b1   :  { %v2152_v27 = vmax.f32 %v4300_v3, 0.0  ;;  %v2154_v34 = vmax.f32 %v4328_v10, 0.0  ;;  %v4329_v39 = vadd.f32 %v2036_v13, %v6013_v24  ;;  %v4302_v18 = vadd.f32 %v1935_v4, %v6017_v33  ;;  %2772 = vmatprep.mubr.bf16.mxu0 %v6063_v19  ;;  %4157 = vmatpush3.bf16.msra.mxu1 %v4927_v38  ;;  %v4869_v11 = vld [vmem:[%s6511_s3 + $0x150] ss:$8 sps:$4 sm:$0xff]   ;;  %v4934_v38 = vld [vmem:[%s6513_s5 + $0x60] sm:$0xff]  }
 0x1b2   :  { %v2155_v41 = vmax.f32 %v4301_v28, 0.0  ;;  %v4330_v31 = vadd.f32 %v2038_v30, %v6019_v16  ;;  %2773 = vmatmul.mubr.bf16.gmra.mrb[32].mxu0 %v6051_v7  ;;  %v6083_v45 = vpack.c.bf16 %v2216_v62, %v2215_v61  ;;  %v4930_v61 = vld [vmem:[%s6513_s5 + $0x50] sm:$0xff]   ;;  %4158 = vmatprep.subr.bf16.mxu1 %v4928_v23 }
 0x1b3   :  { %v2189_v25 = vmax.f32 %v2151_v15, %v2152_v27  ;;  %v2203_v37 = vmax.f32 %v2153_v21, %v2154_v34  ;;  %v2157_v53 = vmax.f32 %v4329_v39, 0.0  ;;  %v2156_v14 = vmax.f32 %v4302_v18, 0.0  ;;  %2818 = vmatpush1.bf16.msra.mxu0 %v4860_v20  ;;  %v4932_v34 = vld [vmem:[%s6513_s5 + $0x58] sm:$0xff]  }
 0x1b4   :  { %v2158_v54 = vmax.f32 %v4330_v31, 0.0  ;;  %2819 = vmatprep.subr.bf16.mxu0 %v4865_v40  ;;  %v4931_v40 = vld [vmem:[%s6513_s5 + $0x10] sm:$0xff]  }
 0x1b5   :  { %v2217_v56 = vmax.f32 %v2189_v25, %v2203_v37  ;;  %v2190_v57 = vmax.f32 %v2155_v41, %v2156_v14  ;;  %v1939_v59 = vpop.f32.mrb[16].mxu0  ;;  %v2042_v32 = vpop.f32.mrb[16].mxu1  ;;  %4159 = vmatpush3.bf16.msra.mxu1 %v4929_v12 }
 0x1b6   :  { %v2204_v29 = vmax.f32 %v2157_v53, %v2158_v54  ;;  %v4303_v51 = vadd.f32 %v1939_v59, %v6011_v9  ;;  %v4331_v47 = vadd.f32 %v2042_v32, %v6013_v24  ;;  %v1941_v36 = vpop.f32.mrb[17].mxu0  ;;  %v2044_v43 = vpop.f32.mrb[17].mxu1  ;;  %4160 = vmatprep.subr.bf16.mxu1 %v4930_v61  ;;  %v4877_v32 = vld [vmem:[%s6511_s3 + $0x174] ss:$8 sps:$4 sm:$0xff]  }
 0x1b7   :  { %v4304_v50 = vadd.f32 %v1941_v36, %v6017_v33  ;;  %v4332_v58 = vadd.f32 %v2044_v43, %v6019_v16  ;;  %2820 = vmatpush1.bf16.msra.mxu0 %v4863_v42  ;;  %v1943_v63 = vpop.f32.mrb[18].mxu0  ;;  %v2046_v48 = vpop.f32.mrb[18].mxu1  ;;  %v6104_v2 = vpack.c.bf16 %v2217_v56, %v2216_v62  ;;  %v4874_v62 = vld [vmem:[%s6511_s3 + $0x164] ss:$8 sps:$4 sm:$0xff]   ;;  %v4872_v42 = vld [vmem:[%s6511_s3 + $0x160] ss:$8 sps:$4 sm:$0xff]  }
 0x1b8   :  { %v2218_v0 = vmax.f32 %v2190_v57, %v2204_v29  ;;  %v2159_v22 = vmax.f32 %v4303_v51, 0.0  ;;  %v2161_v35 = vmax.f32 %v4331_v47, 0.0  ;;  %v4305_v1 = vadd.f32 %v1943_v63, %v6011_v9  ;;  %v1945_v6 = vpop.f32.mrb[19].mxu0  ;;  %v2048_v8 = vpop.f32.mrb[19].mxu1  ;;  %2821 = vmatprep.subr.bf16.mxu0 %v4868_v44 }
 0x1b9   :  { %v2160_v52 = vmax.f32 %v4304_v50, 0.0  ;;  %v2162_v49 = vmax.f32 %v4332_v58, 0.0  ;;  %v4333_v3 = vadd.f32 %v2046_v48, %v6013_v24  ;;  %v4306_v10 = vadd.f32 %v1945_v6, %v6017_v33  ;;  %2782 = vmatprep.mubr.bf16.mxu0 %v6104_v2  ;;  %4161 = vmatpush3.bf16.msra.mxu1 %v4931_v40  ;;  %v4875_v48 = vld [vmem:[%s6511_s3 + $0x170] ss:$8 sps:$4 sm:$0xff]   ;;  %v4883_v40 = vld [vmem:[%s6511_s3 + $0x194] ss:$8 sps:$4 sm:$0xff]  }
 0x1ba   :  { %v2163_v13 = vmax.f32 %v4305_v1, 0.0  ;;  %v4334_v20 = vadd.f32 %v2048_v8, %v6019_v16  ;;  %2783 = vmatmul.mubr.bf16.gmra.mrb[36].mxu0 %v6083_v45  ;;  %v6124_v15 = vpack.c.bf16 %v2218_v0, %v2217_v56  ;;  %4162 = vmatprep.subr.bf16.mxu1 %v4932_v34 }
 0x1bb   :  { %v2191_v21 = vmax.f32 %v2159_v22, %v2160_v52  ;;  %v2205_v28 = vmax.f32 %v2161_v35, %v2162_v49  ;;  %v2165_v4 = vmax.f32 %v4333_v3, 0.0  ;;  %v2164_v30 = vmax.f32 %v4306_v10, 0.0  ;;  %2822 = vmatpush1.bf16.msra.mxu0 %v4866_v46  ;;  %v4933_v46 = vld [vmem:[%s6513_s5 + $0x18] sm:$0xff]   ;;  %v4935_v35 = vld [vmem:[%s6513_s5 + $0x20] sm:$0xff]  }
 0x1bc   :  { %v2166_v27 = vmax.f32 %v4334_v20, 0.0  ;;  %2823 = vmatprep.subr.bf16.mxu0 %v4871_v60  ;;  %v4878_v20 = vld [vmem:[%s6511_s3 + $0x180] ss:$8 sps:$4 sm:$0xff]  }
 0x1bd   :  { %v2219_v39 = vmax.f32 %v2191_v21, %v2205_v28  ;;  %v2192_v18 = vmax.f32 %v2163_v13, %v2164_v30  ;;  %v1949_v41 = vpop.f32.mrb[20].mxu0  ;;  %v2052_v31 = vpop.f32.mrb[20].mxu1  ;;  %4163 = vmatpush3.bf16.msra.mxu1 %v4933_v46 }
 0x1be   :  { %v2206_v44 = vmax.f32 %v2165_v4, %v2166_v27  ;;  %v4307_v25 = vadd.f32 %v1949_v41, %v6011_v9  ;;  %v4335_v37 = vadd.f32 %v2052_v31, %v6013_v24  ;;  %v1951_v53 = vpop.f32.mrb[21].mxu0  ;;  %v2054_v14 = vpop.f32.mrb[21].mxu1  ;;  %4164 = vmatprep.subr.bf16.mxu1 %v4934_v38 }
 0x1bf   :  { %v4308_v54 = vadd.f32 %v1951_v53, %v6017_v33  ;;  %v4336_v55 = vadd.f32 %v2054_v14, %v6019_v16  ;;  %2824 = vmatpush1.bf16.msra.mxu0 %v4869_v11  ;;  %v1953_v56 = vpop.f32.mrb[22].mxu0  ;;  %v2056_v57 = vpop.f32.mrb[22].mxu1  ;;  %v6139_v59 = vpack.c.bf16 %v2219_v39, %v2218_v0  ;;  %v4880_v0 = vld [vmem:[%s6511_s3 + $0x184] ss:$8 sps:$4 sm:$0xff]  }
 0x1c0   :  { %v2220_v23 = vmax.f32 %v2192_v18, %v2206_v44  ;;  %v2167_v29 = vmax.f32 %v4307_v25, 0.0  ;;  %v2169_v51 = vmax.f32 %v4335_v37, 0.0  ;;  %v4309_v47 = vadd.f32 %v1953_v56, %v6011_v9  ;;  %v1955_v36 = vpop.f32.mrb[23].mxu0  ;;  %v2058_v43 = vpop.f32.mrb[23].mxu1  ;;  %2825 = vmatprep.subr.bf16.mxu0 %v4874_v62 }
 0x1c1   :  { %v2168_v60 = vmax.f32 %v4308_v54, 0.0  ;;  %v2170_v50 = vmax.f32 %v4336_v55, 0.0  ;;  %v4337_v58 = vadd.f32 %v2056_v57, %v6013_v24  ;;  %v4310_v63 = vadd.f32 %v1955_v36, %v6017_v33  ;;  %2792 = vmatprep.mubr.bf16.mxu0 %v6139_v59  ;;  %4165 = vmatpush3.bf16.msra.mxu1 %v4935_v35  ;;  %v4881_v57 = vld [vmem:[%s6511_s3 + $0x190] ss:$8 sps:$4 sm:$0xff]   ;;  %v4884_v36 = vld [vmem:[%s6511_s3 + $0x1a0] ss:$8 sps:$4 sm:$0xff]  }
 0x1c2   :  { %v2171_v12 = vmax.f32 %v4309_v47, 0.0  ;;  %v4338_v61 = vadd.f32 %v2058_v43, %v6019_v16  ;;  %2793 = vmatmul.mubr.bf16.gmra.mrb[40].mxu0 %v6124_v15  ;;  %v6162_v22 = vpack.c.bf16 %v2220_v23, %v2219_v39  ;;  %v4898_v35 = vld [vmem:[%s6511_s3 + $0x1e4] ss:$8 sps:$4 sm:$0xff]  }
 0x1c3   :  { %v2193_v1 = vmax.f32 %v2167_v29, %v2168_v60  ;;  %v2207_v6 = vmax.f32 %v2169_v51, %v2170_v50  ;;  %v2173_v8 = vmax.f32 %v4337_v58, 0.0  ;;  %v2172_v52 = vmax.f32 %v4310_v63, 0.0  ;;  %2826 = vmatpush1.bf16.msra.mxu0 %v4872_v42  ;;  %v4889_v60 = vld [vmem:[%s6511_s3 + $0x1b4] ss:$8 sps:$4 sm:$0xff]   ;;  %v4892_v63 = vld [vmem:[%s6511_s3 + $0x1c4] ss:$8 sps:$4 sm:$0xff]  }
 0x1c4   :  { %v2174_v49 = vmax.f32 %v4338_v61, 0.0  ;;  %2827 = vmatprep.subr.bf16.mxu0 %v4877_v32  ;;  %v4895_v61 = vld [vmem:[%s6511_s3 + $0x1d4] ss:$8 sps:$4 sm:$0xff]  }
 0x1c5   :  { %v2221_v3 = vmax.f32 %v2193_v1, %v2207_v6  ;;  %v2194_v10 = vmax.f32 %v2171_v12, %v2172_v52  ;;  %v1959_v11 = vpop.f32.mrb[24].mxu0  ;;  %v2062_v13 = vpop.f32.mrb[24].mxu1  ;;  %v4890_v12 = vld [vmem:[%s6511_s3 + $0x1c0] ss:$8 sps:$4 sm:$0xff]   ;;  %v4901_v6 = vld [vmem:[%s6511_s3 + $0x1f4] ss:$8 sps:$4 sm:$0xff]  }
 0x1c6   :  { %v2208_v62 = vmax.f32 %v2173_v8, %v2174_v49  ;;  %v4311_v21 = vadd.f32 %v1959_v11, %v6011_v9  ;;  %v4339_v28 = vadd.f32 %v2062_v13, %v6013_v24  ;;  %v1961_v4 = vpop.f32.mrb[25].mxu0  ;;  %v2064_v30 = vpop.f32.mrb[25].mxu1  ;;  %v4896_v1 = vld [vmem:[%s6511_s3 + $0x1e0] ss:$8 sps:$4 sm:$0xff]   ;;  %v4899_v8 = vld [vmem:[%s6511_s3 + $0x1f0] ss:$8 sps:$4 sm:$0xff]  }
 0x1c7   :  { %v4312_v27 = vadd.f32 %v1961_v4, %v6017_v33  ;;  %v4340_v34 = vadd.f32 %v2064_v30, %v6019_v16  ;;  %2828 = vmatpush1.bf16.msra.mxu0 %v4875_v48  ;;  %v1963_v39 = vpop.f32.mrb[26].mxu0  ;;  %v2066_v18 = vpop.f32.mrb[26].mxu1  ;;  %v6177_v41 = vpack.c.bf16 %v2221_v3, %v2220_v23  ;;  %v4904_v52 = vld [vmem:[%s6511_s3 + $0x204] ss:$8 sps:$4 sm:$0xff]   ;;  %v4902_v49 = vld [vmem:[%s6511_s3 + $0x200] ss:$8 sps:$4 sm:$0xff]  }
 0x1c8   :  { %v6179_v31 = vmax.f32 %v2194_v10, %v2208_v62  ;;  %v2175_v42 = vmax.f32 %v4311_v21, 0.0  ;;  %v2177_v44 = vmax.f32 %v4339_v28, 0.0  ;;  %v4313_v25 = vadd.f32 %v1963_v39, %v6011_v9  ;;  %v1965_v37 = vpop.f32.mrb[27].mxu0  ;;  %v2068_v53 = vpop.f32.mrb[27].mxu1  ;;  %2829 = vmatprep.subr.bf16.mxu0 %v4880_v0  ;;  %v4886_v9 = vld [vmem:[%s6511_s3 + $0x1a4] ss:$8 sps:$4 sm:$0xff]  }
 0x1c9   :  { %v2176_v14 = vmax.f32 %v4312_v27, 0.0  ;;  %v2178_v54 = vmax.f32 %v4340_v34, 0.0  ;;  %v4341_v55 = vadd.f32 %v2066_v18, %v6013_v24  ;;  %v4314_v56 = vadd.f32 %v1965_v37, %v6017_v33  ;;  %2802 = vmatprep.mubr.bf16.mxu0 %v6177_v41  ;;  %v4893_v0 = vld [vmem:[%s6511_s3 + $0x1d0] ss:$8 sps:$4 sm:$0xff]   ;;  %v4910_v11 = vld [vmem:[%s6511_s3 + $0x224] ss:$8 sps:$4 sm:$0xff]  }
 0x1ca   :  { %v2179_v32 = vmax.f32 %v4313_v25, 0.0  ;;  %v4342_v46 = vadd.f32 %v2068_v53, %v6019_v16  ;;  %2803 = vmatmul.mubr.bf16.gmra.mrb[44].mxu0 %v6162_v22  ;;  %v6194_v38 = vpack.c.bf16 %v6179_v31, %v2221_v3  ;;  %v4907_v3 = vld [vmem:[%s6511_s3 + $0x214] ss:$8 sps:$4 sm:$0xff]   ;;  %v4905_v10 = vld [vmem:[%s6511_s3 + $0x210] ss:$8 sps:$4 sm:$0xff]   ;;  %v4982_v27 = vmov 0  }
 0x1cb   :  { %v2195_v24 = vmax.f32 %v2175_v42, %v2176_v14  ;;  %v2209_v33 = vmax.f32 %v2177_v44, %v2178_v54  ;;  %v2181_v23 = vmax.f32 %v4341_v55, 0.0  ;;  %v2180_v29 = vmax.f32 %v4314_v56, 0.0  ;;  %2830 = vmatpush1.bf16.msra.mxu0 %v4878_v20  ;;  %2845 = vmatprep.mubr.bf16.mxu0 %v6063_v19  ;;  %v4887_v19 = vld [vmem:[%s6511_s3 + $0x1b0] ss:$8 sps:$4 sm:$0xff]   ;;  %v4908_v13 = vld [vmem:[%s6511_s3 + $0x220] ss:$8 sps:$4 sm:$0xff]  }
 0x1cc   :  { %v2182_v51 = vmax.f32 %v4342_v46, 0.0  ;;  %2831 = vmatprep.subr.bf16.mxu0 %v4883_v40  ;;  %v4916_v20 = vld [vmem:[%s6511_s3 + $0x244] ss:$8 sps:$4 sm:$0xff]   ;;  %v4914_v62 = vld [vmem:[%s6511_s3 + $0x240] ss:$8 sps:$4 sm:$0xff]   ;;  %v4940_v39 = vld [vmem:[%s6513_s5 + $0x78] sm:$0xff]  }
 0x1cd   :  { %v6197_v47 = vmax.f32 %v2195_v24, %v2209_v33  ;;  %v2196_v16 = vmax.f32 %v2179_v32, %v2180_v29  ;;  %v4917_v21 = vld [vmem:[%s6511_s3 + $0x250] ss:$8 sps:$4 sm:$0xff]   ;;  %v4922_v28 = vld [vmem:[%s6511_s3 + $0x264] ss:$8 sps:$4 sm:$0xff]   ;;  %v4920_v4 = vld [vmem:[%s6511_s3 + $0x260] ss:$8 sps:$4 sm:$0xff]  }
 0x1ce   :  { %v2210_v43 = vmax.f32 %v2181_v23, %v2182_v51  ;;  %v4925_v30 = vld [vmem:[%s6511_s3 + $0x274] ss:$8 sps:$4 sm:$0xff]   ;;  %v4923_v40 = vld [vmem:[%s6511_s3 + $0x270] ss:$8 sps:$4 sm:$0xff]   ;;  %v4936_v34 = vld [vmem:[%s6513_s5 + $0x68] sm:$0xff]  }
 0x1cf   :  { %2832 = vmatpush1.bf16.msra.mxu0 %v4881_v57  ;;  %v2236_v50 = vpack.c.bf16 %v6197_v47, %v6179_v31  ;;  %4166 = vmatprep.subr.bf16.mxu1 %v4936_v34  ;;  %v4941_v18 = vld [vmem:[%s6513_s5 + $0x38] sm:$0xff]   ;;  %v2318_v31 = vld [vmem:[%s6514_s4] sm:$0x3] }
 0x1d0   :  { %v2224_v58 = vmax.f32 %v2196_v16, %v2210_v43  ;;  %2833 = vmatprep.subr.bf16.mxu0 %v4886_v9  ;;  %v6324_v42 = vrot.slane %v2318_v31, %v43_v26  ;;  %v6328_v44 = vrot.slane %v2318_v31, %v47_v17  ;;  %v4947_v31 = vld [vmem:[%s6513_s5 + $0x90] sm:$0xff]  }
 0x1d2   :  { %v6214_v48 = vpack.c.bf16 %v2224_v58, %v6197_v47 }
 0x1d3   :  { %2834 = vmatpush1.bf16.msra.mxu0 %v4884_v36 }
 0x1d4   :  { %2835 = vmatprep.subr.bf16.mxu0 %v4889_v60 }
 0x1d7   :  { %2836 = vmatpush1.bf16.msra.mxu0 %v4887_v19 }
 0x1d8   :  { %2837 = vmatprep.subr.bf16.mxu0 %v4892_v63 }
 0x1db   :  { %2838 = vmatpush1.bf16.msra.mxu0 %v4890_v12 }
 0x1dc   :  { %2839 = vmatprep.subr.bf16.mxu0 %v4895_v61 }
 0x1df   :  { %2840 = vmatpush1.bf16.msra.mxu0 %v4893_v0 }
 0x1e0   :  { %2841 = vmatprep.subr.bf16.mxu0 %v4898_v35 }
 0x1e3   :  { %2842 = vmatpush1.bf16.msra.mxu0 %v4896_v1 }
 0x1e4   :  { %2843 = vmatprep.subr.bf16.mxu0 %v4901_v6 }
 0x1e7   :  { %2844 = vmatpush1.bf16.msra.mxu0 %v4899_v8 }
 0x1e8   :  { %2896 = vmatprep.subr.bf16.mxu0 %v4904_v52 }
 0x1ea   :  { %2846 = vmatmul.mubr.bf16.vlgmr.msra.gmra.mrb[28].mxu0 %v6051_v7  ;;  %v4913_v7 = vld [vmem:[%s6511_s3 + $0x234] ss:$8 sps:$4 sm:$0xff]  }
 0x1eb   :  { %2855 = vmatprep.mubr.bf16.mxu0 %v6104_v2  ;;  %2897 = vmatpush1.bf16.msra.mxu0 %v4902_v49  ;;  %v4911_v2 = vld [vmem:[%s6511_s3 + $0x230] ss:$8 sps:$4 sm:$0xff]  }
 0x1ec   :  { %2898 = vmatprep.subr.bf16.mxu0 %v4907_v3 }
 0x1ef   :  { %2899 = vmatpush1.bf16.msra.mxu0 %v4905_v10 }
 0x1f0   :  { %2900 = vmatprep.subr.bf16.mxu0 %v4910_v11  ;;  %v4943_v11 = vld [vmem:[%s6513_s5 + $0x80] sm:$0xff]  }
 0x1f2   :  { %2856 = vmatmul.mubr.bf16.gmra.mrb[32].mxu0 %v6083_v45 }
 0x1f3   :  { %2865 = vmatprep.mubr.bf16.mxu0 %v6139_v59  ;;  %2901 = vmatpush1.bf16.msra.mxu0 %v4908_v13  ;;  %v4919_v59 = vld [vmem:[%s6511_s3 + $0x254] ss:$8 sps:$4 sm:$0xff]  }
 0x1f4   :  { %2902 = vmatprep.subr.bf16.mxu0 %v4913_v7 }
 0x1f7   :  { %2903 = vmatpush1.bf16.msra.mxu0 %v4911_v2  ;;  %v4944_v2 = vld [vmem:[%s6513_s5 + $0xc8] sm:$0xff]  }
 0x1f8   :  { %2904 = vmatprep.subr.bf16.mxu0 %v4916_v20 }
 0x1fa   :  { %2866 = vmatmul.mubr.bf16.gmra.mrb[36].mxu0 %v6124_v15 }
 0x1fb   :  { %2875 = vmatprep.mubr.bf16.mxu0 %v6177_v41  ;;  %2905 = vmatpush1.bf16.msra.mxu0 %v4914_v62  ;;  %v4942_v41 = vld [vmem:[%s6513_s5 + $0xc0] sm:$0xff]  }
 0x1fc   :  { %2906 = vmatprep.subr.bf16.mxu0 %v4919_v59 }
 0x1ff   :  { %2907 = vmatpush1.bf16.msra.mxu0 %v4917_v21 }
 0x200   :  { %2908 = vmatprep.subr.bf16.mxu0 %v4922_v28  ;;  %v4945_v28 = vld [vmem:[%s6513_s5 + $0x88] sm:$0xff]  }
 0x202   :  { %2876 = vmatmul.mubr.bf16.gmra.mrb[40].mxu0 %v6162_v22 }
 0x203   :  { %2885 = vmatprep.mubr.bf16.mxu0 %v2236_v50  ;;  %2909 = vmatpush1.bf16.msra.mxu0 %v4920_v4 }
 0x204   :  { %2910 = vmatprep.subr.bf16.mxu0 %v4925_v30 }
 0x207   :  { %2911 = vmatpush1.bf16.msra.mxu0 %v4923_v40  ;;  %v4946_v40 = vld [vmem:[%s6513_s5 + $0xd0] sm:$0xff]  }
 0x20a   :  { %2886 = vmatmul.mubr.bf16.gmra.mrb[44].mxu0 %v6194_v38 }
 0x20b   :  { %2928 = vmatprep.mubr.bf16.mxu0 %v4982_v27 }
 0x212   :  { %2929 = vmatmul.mubr.bf16.vlgmr.msra.gmra.mrb[28].mxu0 %v6083_v45  ;;  %v4937_v45 = vld [vmem:[%s6513_s5 + $0x28] sm:$0xff]  }
 0x213   :  { %2938 = vmatprep.mubr.bf16.mxu0 %v4982_v27  ;;  %4167 = vmatpush3.bf16.msra.mxu1 %v4937_v45 }
 0x21a   :  { %2939 = vmatmul.mubr.bf16.gmra.mrb[32].mxu0 %v6124_v15  ;;  %v4938_v15 = vld [vmem:[%s6513_s5 + $0x70] sm:$0xff]  }
 0x21b   :  { %2948 = vmatprep.mubr.bf16.mxu0 %v4982_v27  ;;  %4168 = vmatprep.subr.bf16.mxu1 %v4938_v15 }
 0x222   :  { %2949 = vmatmul.mubr.bf16.gmra.mrb[36].mxu0 %v6162_v22  ;;  %v4939_v22 = vld [vmem:[%s6513_s5 + $0x30] sm:$0xff]  }
 0x223   :  { %2958 = vmatprep.mubr.bf16.mxu0 %v4982_v27  ;;  %4169 = vmatpush3.bf16.msra.mxu1 %v4939_v22 }
 0x224   :  { %4170 = vmatprep.subr.bf16.mxu1 %v4940_v39 }
 0x227   :  { %4171 = vmatpush3.bf16.msra.mxu1 %v4941_v18 }
 0x228   :  { %4178 = vmatprep.subr.bf16.mxu1 %v4942_v41 }
 0x22a   :  { %2959 = vmatmul.mubr.bf16.gmra.mrb[40].mxu0 %v6194_v38 }
 0x22b   :  { %2968 = vmatprep.mubr.bf16.mxu0 %v4982_v27 }
 0x232   :  { %2969 = vmatmul.mubr.bf16.gmra.mrb[44].mxu0 %v6214_v48 }
 0x2e5   :  { %v2930_v25 = vpop.f32.mrb[28].mxu0 }
 0x2e6   :  { %v4343_v37 = vadd.f32 %v2930_v25, %v6324_v42  ;;  %v2932_v53 = vpop.f32.mrb[29].mxu0 }
 0x2e7   :  { %v4344_v14 = vadd.f32 %v2932_v53, %v6328_v44  ;;  %v2934_v54 = vpop.f32.mrb[30].mxu0 }
 0x2e8   :  { %v2979_v55 = vmax.f32 %v4343_v37, 0.0  ;;  %v4345_v56 = vadd.f32 %v2934_v54, %v6324_v42  ;;  %v2936_v57 = vpop.f32.mrb[31].mxu0  ;;  %v4948_v37 = vld [vmem:[%s6513_s5 + $0xd8] sm:$0xff]  }
 0x2e9   :  { %v2980_v32 = vmax.f32 %v4344_v14, 0.0  ;;  %v4346_v46 = vadd.f32 %v2936_v57, %v6328_v44 }
 0x2ea   :  { %v2981_v26 = vmax.f32 %v4345_v56, 0.0  ;;  %v4949_v56 = vld [vmem:[%s6513_s5 + $0x98] sm:$0xff]  }
 0x2eb   :  { %v2999_v9 = vmax.f32 %v2979_v55, %v2980_v32  ;;  %v2982_v38 = vmax.f32 %v4346_v46, 0.0  ;;  %v4950_v46 = vld [vmem:[%s6513_s5 + $0xe0] sm:$0xff]  }
 0x2ed   :  { %v3000_v5 = vmax.f32 %v2981_v26, %v2982_v38  ;;  %v2940_v17 = vpop.f32.mrb[32].mxu0 }
 0x2ee   :  { %v4347_v24 = vadd.f32 %v2940_v17, %v6324_v42  ;;  %v2942_v33 = vpop.f32.mrb[33].mxu0 }
 0x2ef   :  { %v3009_v23 = vmax.f32 %v2999_v9, %v3000_v5  ;;  %v4348_v29 = vadd.f32 %v2942_v33, %v6328_v44  ;;  %v2944_v51 = vpop.f32.mrb[34].mxu0 }
 0x2f0   :  { %v2983_v47 = vmax.f32 %v4347_v24, 0.0  ;;  %v4349_v16 = vadd.f32 %v2944_v51, %v6324_v42  ;;  %v2946_v36 = vpop.f32.mrb[35].mxu0  ;;  %v4951_v51 = vld [vmem:[%s6513_s5 + $0xa0] sm:$0xff]  }
 0x2f1   :  { %v2984_v43 = vmax.f32 %v4348_v29, 0.0  ;;  %v4350_v60 = vadd.f32 %v2946_v36, %v6328_v44  ;;  %v3014_v13 = vpack.c.bf16 %v3009_v23, %v3009_v23 }
 0x2f2   :  { %v2985_v50 = vmax.f32 %v4349_v16, 0.0  ;;  %v4952_v16 = vld [vmem:[%s6513_s5 + $0xe8] sm:$0xff]  }
 0x2f3   :  { %v3001_v58 = vmax.f32 %v2983_v47, %v2984_v43  ;;  %v2986_v19 = vmax.f32 %v4350_v60, 0.0  ;;  %v4954_v60 = vld [vmem:[%s6513_s5 + $0xf0] sm:$0xff]  }
 0x2f5   :  { %v3002_v63 = vmax.f32 %v2985_v50, %v2986_v19  ;;  %v2950_v48 = vpop.f32.mrb[36].mxu0  ;;  %v4956_v19 = vld [vmem:[%s6513_s5 + $0xf8] sm:$0xff]  }
 0x2f6   :  { %v4351_v12 = vadd.f32 %v2950_v48, %v6324_v42  ;;  %v2952_v61 = vpop.f32.mrb[37].mxu0  ;;  %v4958_v48 = vld [vmem:[%s6513_s5 + $0x100] sm:$0xff]  }
 0x2f7   :  { %v4352_v0 = vadd.f32 %v2952_v61, %v6328_v44  ;;  %v2954_v35 = vpop.f32.mrb[38].mxu0  ;;  %v3010_v1 = vmax.f32 %v3001_v58, %v3002_v63  ;;  %v4955_v58 = vld [vmem:[%s6513_s5 + $0xb0] sm:$0xff]   ;;  %v4957_v63 = vld [vmem:[%s6513_s5 + $0xb8] sm:$0xff]   ;;  %v4983_v61 = vmov 0.0  }
 0x2f8   :  { %v2987_v6 = vmax.f32 %v4351_v12, 0.0  ;;  %v4353_v8 = vadd.f32 %v2954_v35, %v6324_v42  ;;  %v2956_v52 = vpop.f32.mrb[39].mxu0  ;;  %v4960_v35 = vld [vmem:[%s6513_s5 + $0x110] sm:$0xff]  }
 0x2f9   :  { %v2988_v49 = vmax.f32 %v4352_v0, 0.0  ;;  %v4354_v3 = vadd.f32 %v2956_v52, %v6328_v44  ;;  %v3015_v10 = vpack.c.bf16 %v3010_v1, %v3010_v1  ;;  %v4959_v0 = vld [vmem:[%s6513_s5 + $0x108] sm:$0xff]   ;;  %v4961_v1 = vld [vmem:[%s6513_s5 + $0x118] sm:$0xff]   ;;  %v4964_v52 = vld [vmem:[%s6513_s5 + $0x130] sm:$0xff]  }
 0x2fa   :  { %v2989_v7 = vmax.f32 %v4353_v8, 0.0  ;;  %v4963_v8 = vld [vmem:[%s6513_s5 + $0x128] sm:$0xff]  }
 0x2fb   :  { %v3003_v20 = vmax.f32 %v2987_v6, %v2988_v49  ;;  %v2990_v62 = vmax.f32 %v4354_v3, 0.0  ;;  %3378 = vmatprep.mubr.bf16.mxu1 %v3015_v10  ;;  %v4962_v6 = vld [vmem:[%s6513_s5 + $0x120] sm:$0xff]   ;;  %v4965_v49 = vld [vmem:[%s6513_s5 + $0x138] sm:$0xff]  }
 0x2fc   :  { %3379 = vmatmul.mubr.bf16.vlgmr.msra.gmra.mrb[28].mxu1 %v3014_v13  ;;  %v4966_v10 = vld [vmem:[%s6515_s7] sm:$0xff]   ;;  %v4968_v13 = vld [vmem:[%s6515_s7 + $0x10] sm:$0xff]  }
 0x2fd   :  { %v3004_v59 = vmax.f32 %v2989_v7, %v2990_v62  ;;  %4179 = vmatpush3.bf16.msra.mxu1 %v4943_v11  ;;  %v2960_v21 = vpop.f32.mrb[40].mxu0  ;;  %v4967_v11 = vld [vmem:[%s6515_s7 + $0x8] sm:$0xff]   ;;  %v4969_v7 = vld [vmem:[%s6515_s7 + $0x18] sm:$0xff]   ;;  %v4972_v62 = vld [vmem:[%s6515_s7 + $0x30] sm:$0xff]  }
 0x2fe   :  { %v4355_v4 = vadd.f32 %v2960_v21, %v6324_v42  ;;  %v2962_v30 = vpop.f32.mrb[41].mxu0  ;;  %4180 = vmatprep.subr.bf16.mxu1 %v4944_v2  ;;  %v4970_v2 = vld [vmem:[%s6515_s7 + $0x20] sm:$0xff]  }
 0x2ff   :  { %v3011_v27 = vmax.f32 %v3003_v20, %v3004_v59  ;;  %v4356_v34 = vadd.f32 %v2962_v30, %v6328_v44  ;;  %v2964_v45 = vpop.f32.mrb[42].mxu0  ;;  %v4971_v20 = vld [vmem:[%s6515_s7 + $0x28] sm:$0xff]   ;;  %v4973_v59 = vld [vmem:[%s6515_s7 + $0x38] sm:$0xff]  }
 0x300   :  { %v2991_v15 = vmax.f32 %v4355_v4, 0.0  ;;  %v4357_v22 = vadd.f32 %v2964_v45, %v6324_v42  ;;  %v2966_v39 = vpop.f32.mrb[43].mxu0 }
 0x301   :  { %v2992_v18 = vmax.f32 %v4356_v34, 0.0  ;;  %v4358_v41 = vadd.f32 %v2966_v39, %v6328_v44  ;;  %4181 = vmatpush3.bf16.msra.mxu1 %v4945_v28  ;;  %v3016_v12 = vpack.c.bf16 %v3011_v27, %v3011_v27  ;;  %v4097_v27 = vld [vmem:[%s6517_s6] ss:$0 sm:$0xff] }
 0x302   :  { %v2993_v25 = vmax.f32 %v4357_v22, 0.0  ;;  %4182 = vmatprep.subr.bf16.mxu1 %v4946_v40 }
 0x303   :  { %v3005_v53 = vmax.f32 %v2991_v15, %v2992_v18  ;;  %v2994_v14 = vmax.f32 %v4358_v41, 0.0 }
 0x305   :  { %v3006_v54 = vmax.f32 %v2993_v25, %v2994_v14  ;;  %4183 = vmatpush3.bf16.msra.mxu1 %v4947_v31  ;;  %v2970_v55 = vpop.f32.mrb[44].mxu0 }
 0x306   :  { %v4359_v57 = vadd.f32 %v2970_v55, %v6324_v42  ;;  %v2972_v32 = vpop.f32.mrb[45].mxu0  ;;  %4184 = vmatprep.subr.bf16.mxu1 %v4948_v37  ;;  %v4974_v55 = vld [vmem:[%s6516_s9] sm:$0xff]  }
 0x307   :  { %v4360_v26 = vadd.f32 %v2972_v32, %v6328_v44  ;;  %v2974_v9 = vpop.f32.mrb[46].mxu0  ;;  %v3012_v38 = vmax.f32 %v3005_v53, %v3006_v54  ;;  %v4976_v32 = vld [vmem:[%s6516_s9 + $0x10] sm:$0xff]  }
 0x308   :  { %v2995_v5 = vmax.f32 %v4359_v57, 0.0  ;;  %v4361_v17 = vadd.f32 %v2974_v9, %v6324_v42  ;;  %v2976_v24 = vpop.f32.mrb[47].mxu0  ;;  %v4975_v57 = vld [vmem:[%s6516_s9 + $0x8] sm:$0xff]  }
 0x309   :  { %v2996_v33 = vmax.f32 %v4360_v26, 0.0  ;;  %v4362_v23 = vadd.f32 %v2976_v24, %v6328_v44  ;;  %4185 = vmatpush3.bf16.msra.mxu1 %v4949_v56  ;;  %v3017_v29 = vpack.c.bf16 %v3012_v38, %v3012_v38  ;;  %v4953_v44 = vld [vmem:[%s6513_s5 + $0xa8] sm:$0xff]   ;;  %v4978_v26 = vld [vmem:[%s6516_s9 + $0x20] sm:$0xff]   ;;  %v4980_v38 = vld [vmem:[%s6516_s9 + $0x30] sm:$0xff]  }
 0x30a   :  { %v2997_v47 = vmax.f32 %v4361_v17, 0.0  ;;  %4186 = vmatprep.subr.bf16.mxu1 %v4950_v46  ;;  %v4977_v46 = vld [vmem:[%s6516_s9 + $0x18] sm:$0xff]   ;;  %v4979_v9 = vld [vmem:[%s6516_s9 + $0x28] sm:$0xff]   ;;  %v4138_v17 = vld [vmem:[%s6518_s8] ss:$0 sm:$0xff] }
 0x30b   :  { %v3007_v36 = vmax.f32 %v2995_v5, %v2996_v33  ;;  %v2998_v43 = vmax.f32 %v4362_v23, 0.0  ;;  %3418 = vmatprep.mubr.bf16.mxu1 %v3017_v29  ;;  %v4981_v5 = vld [vmem:[%s6516_s9 + $0x38] sm:$0xff]  }
 0x30d   :  { %v3008_v42 = vmax.f32 %v2997_v47, %v2998_v43  ;;  %4187 = vmatpush3.bf16.msra.mxu1 %v4951_v51 }
 0x30e   :  { %4188 = vmatprep.subr.bf16.mxu1 %v4952_v16 }
 0x30f   :  { %v3013_v50 = vmax.f32 %v3007_v36, %v3008_v42  ;;  %v4147_v36 = vld [vmem:[%s6519_s10] ss:$0 sm:$0xff] }
 0x311   :  { %4189 = vmatpush3.bf16.msra.mxu1 %v4953_v44  ;;  %v3018_v3 = vpack.c.bf16 %v3013_v50, %v3013_v50 }
 0x312   :  { %4190 = vmatprep.subr.bf16.mxu1 %v4954_v60 }
 0x315   :  { %4191 = vmatpush3.bf16.msra.mxu1 %v4955_v58 }
 0x316   :  { %4192 = vmatprep.subr.bf16.mxu1 %v4956_v19 }
 0x319   :  { %4193 = vmatpush3.bf16.msra.mxu1 %v4957_v63 }
 0x31a   :  { %4227 = vmatprep.subr.bf16.mxu1 %v4983_v61 }
 0x31c   :  { %3419 = vmatmul.mubr.bf16.vlgmr.msra.gmra.mrb[32].mxu1 %v3016_v12 }
 0x31d   :  { %4228 = vmatpush3.bf16.msra.mxu1 %v4958_v48  ;;  %4243 = vmatprep.mubr.msk.bf16.mxu1 %vm4984_vm0, %v4983_v61 }
 0x31e   :  { %4229 = vmatprep.subr.bf16.mxu1 %v4983_v61 }
 0x321   :  { %4230 = vmatpush3.bf16.msra.mxu1 %v4959_v0 }
 0x322   :  { %4231 = vmatprep.subr.bf16.mxu1 %v4983_v61 }
 0x325   :  { %4232 = vmatpush3.bf16.msra.mxu1 %v4960_v35 }
 0x326   :  { %4233 = vmatprep.subr.bf16.mxu1 %v4983_v61 }
 0x329   :  { %4234 = vmatpush3.bf16.msra.mxu1 %v4961_v1 }
 0x32a   :  { %4235 = vmatprep.subr.bf16.mxu1 %v4983_v61 }
 0x32d   :  { %4236 = vmatpush3.bf16.msra.mxu1 %v4962_v6 }
 0x32e   :  { %4237 = vmatprep.subr.bf16.mxu1 %v4983_v61 }
 0x331   :  { %4238 = vmatpush3.bf16.msra.mxu1 %v4963_v8 }
 0x332   :  { %4239 = vmatprep.subr.bf16.mxu1 %v4983_v61 }
 0x335   :  { %4240 = vmatpush3.bf16.msra.mxu1 %v4964_v52 }
 0x336   :  { %4241 = vmatprep.subr.bf16.mxu1 %v4983_v61 }
 0x339   :  { %4242 = vmatpush3.bf16.msra.mxu1 %v4965_v49 }
 0x33a   :  { %4247 = vmatprep.subr.bf16.mxu1 %v4983_v61 }
 0x33c   :  { %4244 = vmatmul.mubr.bf16.vlgmr.msra.gmra.mrb[36].mxu1 %v3018_v3 }
 0x33d   :  { %4263 = vmatprep.mubr.msk.bf16.mxu1 %vm4984_vm0, %v4983_v61  ;;  %4248 = vmatpush3.bf16.msra.mxu1 %v4966_v10 }
 0x33e   :  { %4249 = vmatprep.subr.bf16.mxu1 %v4983_v61 }
 0x341   :  { %4250 = vmatpush3.bf16.msra.mxu1 %v4967_v11 }
 0x342   :  { %4251 = vmatprep.subr.bf16.mxu1 %v4983_v61 }
 0x345   :  { %4252 = vmatpush3.bf16.msra.mxu1 %v4968_v13 }
 0x346   :  { %4253 = vmatprep.subr.bf16.mxu1 %v4983_v61 }
 0x349   :  { %4254 = vmatpush3.bf16.msra.mxu1 %v4969_v7 }
 0x34a   :  { %4255 = vmatprep.subr.bf16.mxu1 %v4983_v61 }
 0x34d   :  { %4256 = vmatpush3.bf16.msra.mxu1 %v4970_v2 }
 0x34e   :  { %4257 = vmatprep.subr.bf16.mxu1 %v4983_v61 }
 0x351   :  { %4258 = vmatpush3.bf16.msra.mxu1 %v4971_v20 }
 0x352   :  { %4259 = vmatprep.subr.bf16.mxu1 %v4983_v61 }
 0x355   :  { %4260 = vmatpush3.bf16.msra.mxu1 %v4972_v62 }
 0x356   :  { %4261 = vmatprep.subr.bf16.mxu1 %v4983_v61 }
 0x359   :  { %4262 = vmatpush3.bf16.msra.mxu1 %v4973_v59 }
 0x35a   :  { %4267 = vmatprep.subr.bf16.mxu1 %v4983_v61 }
 0x3cf   :  { %v4172_v21 = vpop.f32.mrb[28].mxu1 }
 0x3d0   :  { %v4173_v28 = vpop.f32.mrb[29].mxu1 }
 0x3d1   :  { %v4174_v4 = vadd.f32 %v4173_v28, %v4172_v21  ;;  %v4175_v30 = vpop.f32.mrb[30].mxu1 }
 0x3d2   :  { %v4176_v40 = vpop.f32.mrb[31].mxu1 }
 0x3d3   :  { %v3381_v15 = vadd.f32 %v4174_v4, %v4097_v27 }
 0x3ef   :  { %v4194_v34 = vpop.f32.mrb[32].mxu1 }
 0x3f0   :  { %v4195_v45 = vpop.f32.mrb[33].mxu1 }
 0x3f1   :  { %v4196_v22 = vadd.f32 %v4195_v45, %v4194_v34  ;;  %v4197_v39 = vpop.f32.mrb[34].mxu1 }
 0x3f2   :  { %v4198_v18 = vpop.f32.mrb[35].mxu1 }
 0x3f3   :  { %v3421_v41 = vadd.f32 %v4196_v22, %v3381_v15 }
 0x40f   :  { %v3460_v31 = vpop.f32.mrb[36].mxu1 }
 0x410   :  { %v3461_v25 = vadd.f32 %v3460_v31, %v3421_v41  ;;  %v4245_v37 = vpop.f32.mrb[37].mxu1 }
 0x411   :  { %v3463_v53 = vpop.f32.mrb[38].mxu1 }
 0x412   :  { %v3466_v14 = vmax.f32 %v3461_v25, 0.0  ;;  %v4246_v54 = vpop.f32.mrb[39].mxu1 }
 0x414   :  { %v3467_v56 = vpack.c.bf16 %v3466_v14, %v3466_v14 }
 0x416   :  { %4264 = vmatmul.mubr.bf16.vlgmr.msra.gmra.mrb[40].mxu1 %v3467_v56 }
 0x417   :  { %4268 = vmatpush3.bf16.msra.mxu1 %v4974_v55  ;;  %4283 = vmatprep.mubr.msk.bf16.mxu1 %vm4984_vm0, %v4983_v61 }
 0x418   :  { %4269 = vmatprep.subr.bf16.mxu1 %v4983_v61 }
 0x41b   :  { %4270 = vmatpush3.bf16.msra.mxu1 %v4975_v57 }
 0x41c   :  { %4271 = vmatprep.subr.bf16.mxu1 %v4983_v61 }
 0x41f   :  { %4272 = vmatpush3.bf16.msra.mxu1 %v4976_v32 }
 0x420   :  { %4273 = vmatprep.subr.bf16.mxu1 %v4983_v61 }
 0x423   :  { %4274 = vmatpush3.bf16.msra.mxu1 %v4977_v46 }
 0x424   :  { %4275 = vmatprep.subr.bf16.mxu1 %v4983_v61 }
 0x427   :  { %4276 = vmatpush3.bf16.msra.mxu1 %v4978_v26 }
 0x428   :  { %4277 = vmatprep.subr.bf16.mxu1 %v4983_v61 }
 0x42b   :  { %4278 = vmatpush3.bf16.msra.mxu1 %v4979_v9 }
 0x42c   :  { %4279 = vmatprep.subr.bf16.mxu1 %v4983_v61 }
 0x42f   :  { %4280 = vmatpush3.bf16.msra.mxu1 %v4980_v38 }
 0x430   :  { %4281 = vmatprep.subr.bf16.mxu1 %v4983_v61 }
 0x433   :  { %4282 = vmatpush3.bf16.msra.mxu1 %v4981_v5 }
 0x4e9   :  { %v3573_v24 = vpop.f32.mrb[40].mxu1 }
 0x4ea   :  { %v3574_v33 = vadd.f32 %v4138_v17, %v3573_v24  ;;  %v4265_v23 = vpop.f32.mrb[41].mxu1 }
 0x4eb   :  { %v3576_v29 = vpop.f32.mrb[42].mxu1 }
 0x4ec   :  { %v3579_v51 = vmax.f32 %v3574_v33, 0.0  ;;  %v4266_v47 = vpop.f32.mrb[43].mxu1 }
 0x4ee   :  { %v3580_v16 = vpack.c.bf16 %v3579_v51, %v3579_v51 }
 0x4f0   :  { %4284 = vmatmul.mubr.bf16.vlgmr.msra.gmra.mrb[44].mxu1 %v3580_v16 }
 0x5c3   :  { %v3686_v43 = vpop.f32.mrb[44].mxu1 }
 0x5c4   :  { %v3687_v42 = vadd.f32 %v4147_v36, %v3686_v43  ;;  %v4285_v44 = vpop.f32.mrb[45].mxu1 }
 0x5c5   :  { %v3689_v60 = vpop.f32.mrb[46].mxu1 }
 0x5c6   :  { %3692 = vst [vmem:[%s6520_s11] sm:$0xff] %v3687_v42  ;;  %v4286_v50 = vpop.f32.mrb[47].mxu1 }

</bundles_post_ra>
